<compile_context>
chip_gen: v5e
topology: v5e:2x2
jax: 0.10.0
libtpu: 0.0.40
codegen_flags: <defaults>
</compile_context>

<pallas_src>
import functools

import jax
import jax.numpy as jnp
from jax import lax
from jax.experimental import pallas as pl
from jax.experimental.pallas import tpu as pltpu

# Module hyper-params (defaults of Resolver.__init__)
HIRES_FIELDS = 3
FILTERS = (6, 12)
OUTPUT_CHANNELS = 1
FINAL_RELU = False
CONSTRAINT_IND = 1  # int case: fine_inputs[:, ci:ci+1, :, :]


def resolver_kernel(x_ref, w1_ref, b1_ref, w2_ref, b2_ref, w3_ref, b3_ref,
                    o_ref, *, constraint_ind, final_relu, gelu_approximate,
                    chunk_rows, n_chunks, unroll):
    """x_ref: (C_in, ROWS, 128) VMEM; o_ref: (C_out, ROWS, 128) VMEM.

    Weights / biases are whole arrays in SMEM, read as scalars.
    """
    c_in = x_ref.shape[0]
    c1 = w1_ref.shape[0]
    c2 = w2_ref.shape[0]
    c_out = w3_ref.shape[0]

    # Note: the exact (erf) path relies on erf lowering support in Mosaic; the
    # default tanh path only needs tanh (EUP).
    gelu = functools.partial(jax.nn.gelu, approximate=gelu_approximate)

    # Hoist every scalar weight/bias read (SMEM -> sreg) out of the chunk loop.
    w1 = [[w1_ref[j, k] for k in range(c_in)] for j in range(c1)]
    b1 = [b1_ref[j] for j in range(c1)]
    w2 = [[w2_ref[j, k] for k in range(c1)] for j in range(c2)]
    b2 = [b2_ref[j] for j in range(c2)]
    w3 = [[w3_ref[c, j] for j in range(c2)] for c in range(c_out)]
    b3 = [b3_ref[c] for c in range(c_out)]

    def chunk_body(step, carry):
        off = step * chunk_rows
        if not isinstance(off, int):
            off = pl.multiple_of(off, chunk_rows)
        rows = pl.ds(off, chunk_rows)

        # C_in dense (chunk_rows, 128) slabs for this chunk; compute in f32.
        x = [x_ref[k, rows, :].astype(jnp.float32) for k in range(c_in)]
        gate = x[constraint_ind]

        # Layer 1: C_in -> C1, scalar-weight FMAs on dense slabs + GELU.
        h1 = []
        for j in range(c1):
            acc = jnp.full_like(x[0], b1[j])
            for k in range(c_in):
                acc = acc + x[k] * w1[j][k]
            h1.append(gelu(acc))
        # TODO(synk): nn.Dropout is identity at inference; training-mode
        # dropout is not implemented.

        # Layer 2 (C1 -> C2) fused with layer 3 (C2 -> C_out): accumulate
        # r[c] += w3[c, j] * gelu(h2_j) without materializing h2.
        r = [jnp.full_like(x[0], b3[c]) for c in range(c_out)]
        for j in range(c2):
            acc = jnp.full_like(x[0], b2[j])
            for k in range(c1):
                acc = acc + h1[k] * w2[j][k]
            h2_j = gelu(acc)
            for c in range(c_out):
                r[c] = r[c] + h2_j * w3[c][j]

        for c in range(c_out):
            out = r[c] * gate
            if final_relu:
                out = jnp.maximum(out, 0.0)
            o_ref[c, rows, :] = out.astype(o_ref.dtype)
        return carry

    lax.fori_loop(0, n_chunks, chunk_body, 0, unroll=unroll)


def resolver_forward(fine_inputs, params, *,
                     constraint_ind=CONSTRAINT_IND,
                     final_relu=FINAL_RELU,
                     gelu_approximate=True,
                     block_rows=512,
                     chunk_rows=16):
    """fine_inputs: (B, C_in, H, W) NCHW, like the PyTorch module.

    params: (w1, b1, w2, b2, w3, b3) with w_i == conv_i.weight[..., 0, 0] of
    shape (C_out_i, C_in_i) and b_i == conv_i.bias of shape (C_out_i,).

    Only the integer `constraint_inds` branch of Resolver.forward is
    implemented.  gelu_approximate=True (default, per perf review) uses the
    f32 tanh GELU on the EUP; set False for nn.GELU()'s exact erf form.
    """
    w1, b1, w2, b2, w3, b3 = (p.astype(jnp.float32) for p in params)
    B, C_in, H, W = fine_inputs.shape
    C1, C2, C_out = w1.shape[0], w2.shape[0], w3.shape[0]
    HW = H * W

    # H*W -> (rows, 128) dense per-channel slabs (pure reshape, no transpose).
    r_rows = pl.cdiv(HW, 128)
    r_rows = pl.cdiv(r_rows, 8) * 8                        # sublane multiple
    blk = max(8, min(block_rows, r_rows))
    blk = (blk // 8) * 8
    # v7x: keep >= ~8 grid steps so both TensorCores get work.
    while B * pl.cdiv(r_rows, blk) < 8 and blk > 8:
        blk = max(8, ((blk // 2) // 8) * 8)
    n_tiles = pl.cdiv(r_rows, blk)
    r_full = n_tiles * blk
    hw_full = r_full * 128

    # Inner register-resident chunk: multiple of 8 sublanes dividing blk.
    chunk = max(8, min(chunk_rows, blk))
    chunk = (chunk // 8) * 8
    while blk % chunk != 0:
        chunk -= 8
    n_chunks = blk // chunk
    unroll = True if n_chunks <= 8 else 2

    x = fine_inputs.reshape(B, C_in, HW)
    if hw_full != HW:
        x = jnp.pad(x, ((0, 0), (0, 0), (0, hw_full - HW)))
    x = x.reshape(B, C_in, r_full, 128)

    kernel = functools.partial(
        resolver_kernel,
        constraint_ind=constraint_ind, final_relu=final_relu,
        gelu_approximate=gelu_approximate,
        chunk_rows=chunk, n_chunks=n_chunks, unroll=unroll)

    smem = lambda: pl.BlockSpec(memory_space=pltpu.MemorySpace.SMEM)
    out = pl.pallas_call(
        kernel,
        out_shape=jax.ShapeDtypeStruct((B, C_out, r_full, 128),
                                       fine_inputs.dtype),
        grid=(B, n_tiles),
        in_specs=[
            pl.BlockSpec((None, C_in, blk, 128), lambda b, n: (b, 0, n, 0)),
            smem(), smem(), smem(), smem(), smem(), smem(),
        ],
        out_specs=pl.BlockSpec((None, C_out, blk, 128),
                               lambda b, n: (b, 0, n, 0)),
        compiler_params=pltpu.CompilerParams(
            dimension_semantics=("parallel", "parallel")),
    )(x, w1, b1, w2, b2, w3, b3)

    out = out.reshape(B, C_out, hw_full)
    if hw_full != HW:
        out = out[:, :, :HW]
    return out.reshape(B, C_out, H, W)


def init_params(key):
    """Deterministic init matching Conv2d(1x1): weights (C_out, C_in), biases (C_out,)."""
    ks = jax.random.split(key, 6)
    w1 = jax.random.normal(ks[0], (FILTERS[0], HIRES_FIELDS), jnp.float32) * 0.5
    b1 = jax.random.normal(ks[1], (FILTERS[0],), jnp.float32) * 0.1
    w2 = jax.random.normal(ks[2], (FILTERS[1], FILTERS[0]), jnp.float32) * 0.5
    b2 = jax.random.normal(ks[3], (FILTERS[1],), jnp.float32) * 0.1
    w3 = jax.random.normal(ks[4], (OUTPUT_CHANNELS, FILTERS[1]), jnp.float32) * 0.5
    b3 = jax.random.normal(ks[5], (OUTPUT_CHANNELS,), jnp.float32) * 0.1
    return (w1, b1, w2, b2, w3, b3)


def resolver_reference(fine_inputs, params, constraint_ind=CONSTRAINT_IND,
                       final_relu=FINAL_RELU, gelu_approximate=True):
    """Pure-JAX reference mirroring the PyTorch forward (NCHW, 1x1 convs)."""
    w1, b1, w2, b2, w3, b3 = params
    act = lambda v: jax.nn.gelu(v, approximate=gelu_approximate)

    def conv1x1(t, w, b):                      # t: (B,C,H,W), w: (O,C), b: (O,)
        y = jnp.einsum('oc,bchw->bohw', w, t,
                       precision=jax.lax.Precision.HIGHEST)
        return y + b[None, :, None, None]

    h1 = act(conv1x1(fine_inputs, w1, b1))
    h2 = act(conv1x1(h1, w2, b2))
    r = conv1x1(h2, w3, b3)
    gate = fine_inputs[:, constraint_ind:constraint_ind + 1, :, :]
    out = r * gate
    if final_relu:
        out = jnp.maximum(out, 0.0)
    return out


if __name__ == "__main__":
    key = jax.random.PRNGKey(0)
    k_in, k_coarse, k_params = jax.random.split(key, 3)

    B, C, Hs, Ws = 2, HIRES_FIELDS, 16, 16
    fine_inputs = jax.random.normal(k_in, (B, C, Hs, Ws), jnp.float32)
    coarse_inputs = jax.random.normal(k_coarse, (B, C, 4, 4), jnp.float32)  # unused by forward
    params = init_params(k_params)

    # Default (tanh GELU) path.
    out = resolver_forward(fine_inputs, params)
    out = jax.block_until_ready(out)
    assert out.shape == (B, OUTPUT_CHANNELS, Hs, Ws)
    ref = resolver_reference(fine_inputs, params)
    assert jnp.allclose(out, ref, atol=1e-4, rtol=1e-4), \
        float(jnp.max(jnp.abs(out - ref)))

    # Non-128-multiple spatial size + final_relu=True exercises padding/slicing.
    fine2 = jax.random.normal(jax.random.PRNGKey(1), (1, C, 17, 19), jnp.float32)
    out2 = jax.block_until_ready(
        resolver_forward(fine2, params, final_relu=True))
    ref2 = resolver_reference(fine2, params, final_relu=True)
    assert out2.shape == (1, OUTPUT_CHANNELS, 17, 19)
    assert jnp.allclose(out2, ref2, atol=1e-4, rtol=1e-4), \
        float(jnp.max(jnp.abs(out2 - ref2)))

    print("KERNEL_OK")
</pallas_src>

<mosaic_0001>
module attributes {stable_mosaic.version = 11 : i64} {
  func.func @resolver_kernel(%arg0: i32, %arg1: i32, %arg2: memref<1x3x8x128xf32, #tpu.memory_space<vmem>>, %arg3: memref<6x3xf32, #tpu.memory_space<smem>>, %arg4: memref<6xf32, #tpu.memory_space<smem>>, %arg5: memref<12x6xf32, #tpu.memory_space<smem>>, %arg6: memref<12xf32, #tpu.memory_space<smem>>, %arg7: memref<1x12xf32, #tpu.memory_space<smem>>, %arg8: memref<1xf32, #tpu.memory_space<smem>>, %arg9: memref<1x1x8x128xf32, #tpu.memory_space<vmem>>) attributes {dimension_semantics = [#tpu.dimension_semantics<parallel>, #tpu.dimension_semantics<parallel>], iteration_bounds = array<i64: 2, 1>, scalar_prefetch = 0 : i64, scratch_operands = 0 : i64, tpu.core_type = #tpu.core_type<tc>, window_params = [{transform_indices = @transform_0, window_bounds = array<i64: 1, 3, 8, 128>}, {transform_indices = @transform_1, window_bounds = array<i64: 6, 3>}, {transform_indices = @transform_2, window_bounds = array<i64: 6>}, {transform_indices = @transform_3, window_bounds = array<i64: 12, 6>}, {transform_indices = @transform_4, window_bounds = array<i64: 12>}, {transform_indices = @transform_5, window_bounds = array<i64: 1, 12>}, {transform_indices = @transform_6, window_bounds = array<i64: 1>}, {transform_indices = @transform_7, window_bounds = array<i64: 1, 1, 8, 128>}]} {
    %c0 = arith.constant 0 : index
    %c0_0 = arith.constant 0 : index
    %0 = memref.load %arg3[%c0, %c0_0] : memref<6x3xf32, #tpu.memory_space<smem>>
    %c0_1 = arith.constant 0 : index
    %c1 = arith.constant 1 : index
    %1 = memref.load %arg3[%c0_1, %c1] : memref<6x3xf32, #tpu.memory_space<smem>>
    %c0_2 = arith.constant 0 : index
    %c2 = arith.constant 2 : index
    %2 = memref.load %arg3[%c0_2, %c2] : memref<6x3xf32, #tpu.memory_space<smem>>
    %c1_3 = arith.constant 1 : index
    %c0_4 = arith.constant 0 : index
    %3 = memref.load %arg3[%c1_3, %c0_4] : memref<6x3xf32, #tpu.memory_space<smem>>
    %c1_5 = arith.constant 1 : index
    %c1_6 = arith.constant 1 : index
    %4 = memref.load %arg3[%c1_5, %c1_6] : memref<6x3xf32, #tpu.memory_space<smem>>
    %c1_7 = arith.constant 1 : index
    %c2_8 = arith.constant 2 : index
    %5 = memref.load %arg3[%c1_7, %c2_8] : memref<6x3xf32, #tpu.memory_space<smem>>
    %c2_9 = arith.constant 2 : index
    %c0_10 = arith.constant 0 : index
    %6 = memref.load %arg3[%c2_9, %c0_10] : memref<6x3xf32, #tpu.memory_space<smem>>
    %c2_11 = arith.constant 2 : index
    %c1_12 = arith.constant 1 : index
    %7 = memref.load %arg3[%c2_11, %c1_12] : memref<6x3xf32, #tpu.memory_space<smem>>
    %c2_13 = arith.constant 2 : index
    %c2_14 = arith.constant 2 : index
    %8 = memref.load %arg3[%c2_13, %c2_14] : memref<6x3xf32, #tpu.memory_space<smem>>
    %c3 = arith.constant 3 : index
    %c0_15 = arith.constant 0 : index
    %9 = memref.load %arg3[%c3, %c0_15] : memref<6x3xf32, #tpu.memory_space<smem>>
    %c3_16 = arith.constant 3 : index
    %c1_17 = arith.constant 1 : index
    %10 = memref.load %arg3[%c3_16, %c1_17] : memref<6x3xf32, #tpu.memory_space<smem>>
    %c3_18 = arith.constant 3 : index
    %c2_19 = arith.constant 2 : index
    %11 = memref.load %arg3[%c3_18, %c2_19] : memref<6x3xf32, #tpu.memory_space<smem>>
    %c4 = arith.constant 4 : index
    %c0_20 = arith.constant 0 : index
    %12 = memref.load %arg3[%c4, %c0_20] : memref<6x3xf32, #tpu.memory_space<smem>>
    %c4_21 = arith.constant 4 : index
    %c1_22 = arith.constant 1 : index
    %13 = memref.load %arg3[%c4_21, %c1_22] : memref<6x3xf32, #tpu.memory_space<smem>>
    %c4_23 = arith.constant 4 : index
    %c2_24 = arith.constant 2 : index
    %14 = memref.load %arg3[%c4_23, %c2_24] : memref<6x3xf32, #tpu.memory_space<smem>>
    %c5 = arith.constant 5 : index
    %c0_25 = arith.constant 0 : index
    %15 = memref.load %arg3[%c5, %c0_25] : memref<6x3xf32, #tpu.memory_space<smem>>
    %c5_26 = arith.constant 5 : index
    %c1_27 = arith.constant 1 : index
    %16 = memref.load %arg3[%c5_26, %c1_27] : memref<6x3xf32, #tpu.memory_space<smem>>
    %c5_28 = arith.constant 5 : index
    %c2_29 = arith.constant 2 : index
    %17 = memref.load %arg3[%c5_28, %c2_29] : memref<6x3xf32, #tpu.memory_space<smem>>
    %c0_30 = arith.constant 0 : index
    %18 = memref.load %arg4[%c0_30] : memref<6xf32, #tpu.memory_space<smem>>
    %c1_31 = arith.constant 1 : index
    %19 = memref.load %arg4[%c1_31] : memref<6xf32, #tpu.memory_space<smem>>
    %c2_32 = arith.constant 2 : index
    %20 = memref.load %arg4[%c2_32] : memref<6xf32, #tpu.memory_space<smem>>
    %c3_33 = arith.constant 3 : index
    %21 = memref.load %arg4[%c3_33] : memref<6xf32, #tpu.memory_space<smem>>
    %c4_34 = arith.constant 4 : index
    %22 = memref.load %arg4[%c4_34] : memref<6xf32, #tpu.memory_space<smem>>
    %c5_35 = arith.constant 5 : index
    %23 = memref.load %arg4[%c5_35] : memref<6xf32, #tpu.memory_space<smem>>
    %c0_36 = arith.constant 0 : index
    %c0_37 = arith.constant 0 : index
    %24 = memref.load %arg5[%c0_36, %c0_37] : memref<12x6xf32, #tpu.memory_space<smem>>
    %c0_38 = arith.constant 0 : index
    %c1_39 = arith.constant 1 : index
    %25 = memref.load %arg5[%c0_38, %c1_39] : memref<12x6xf32, #tpu.memory_space<smem>>
    %c0_40 = arith.constant 0 : index
    %c2_41 = arith.constant 2 : index
    %26 = memref.load %arg5[%c0_40, %c2_41] : memref<12x6xf32, #tpu.memory_space<smem>>
    %c0_42 = arith.constant 0 : index
    %c3_43 = arith.constant 3 : index
    %27 = memref.load %arg5[%c0_42, %c3_43] : memref<12x6xf32, #tpu.memory_space<smem>>
    %c0_44 = arith.constant 0 : index
    %c4_45 = arith.constant 4 : index
    %28 = memref.load %arg5[%c0_44, %c4_45] : memref<12x6xf32, #tpu.memory_space<smem>>
    %c0_46 = arith.constant 0 : index
    %c5_47 = arith.constant 5 : index
    %29 = memref.load %arg5[%c0_46, %c5_47] : memref<12x6xf32, #tpu.memory_space<smem>>
    %c1_48 = arith.constant 1 : index
    %c0_49 = arith.constant 0 : index
    %30 = memref.load %arg5[%c1_48, %c0_49] : memref<12x6xf32, #tpu.memory_space<smem>>
    %c1_50 = arith.constant 1 : index
    %c1_51 = arith.constant 1 : index
    %31 = memref.load %arg5[%c1_50, %c1_51] : memref<12x6xf32, #tpu.memory_space<smem>>
    %c1_52 = arith.constant 1 : index
    %c2_53 = arith.constant 2 : index
    %32 = memref.load %arg5[%c1_52, %c2_53] : memref<12x6xf32, #tpu.memory_space<smem>>
    %c1_54 = arith.constant 1 : index
    %c3_55 = arith.constant 3 : index
    %33 = memref.load %arg5[%c1_54, %c3_55] : memref<12x6xf32, #tpu.memory_space<smem>>
    %c1_56 = arith.constant 1 : index
    %c4_57 = arith.constant 4 : index
    %34 = memref.load %arg5[%c1_56, %c4_57] : memref<12x6xf32, #tpu.memory_space<smem>>
    %c1_58 = arith.constant 1 : index
    %c5_59 = arith.constant 5 : index
    %35 = memref.load %arg5[%c1_58, %c5_59] : memref<12x6xf32, #tpu.memory_space<smem>>
    %c2_60 = arith.constant 2 : index
    %c0_61 = arith.constant 0 : index
    %36 = memref.load %arg5[%c2_60, %c0_61] : memref<12x6xf32, #tpu.memory_space<smem>>
    %c2_62 = arith.constant 2 : index
    %c1_63 = arith.constant 1 : index
    %37 = memref.load %arg5[%c2_62, %c1_63] : memref<12x6xf32, #tpu.memory_space<smem>>
    %c2_64 = arith.constant 2 : index
    %c2_65 = arith.constant 2 : index
    %38 = memref.load %arg5[%c2_64, %c2_65] : memref<12x6xf32, #tpu.memory_space<smem>>
    %c2_66 = arith.constant 2 : index
    %c3_67 = arith.constant 3 : index
    %39 = memref.load %arg5[%c2_66, %c3_67] : memref<12x6xf32, #tpu.memory_space<smem>>
    %c2_68 = arith.constant 2 : index
    %c4_69 = arith.constant 4 : index
    %40 = memref.load %arg5[%c2_68, %c4_69] : memref<12x6xf32, #tpu.memory_space<smem>>
    %c2_70 = arith.constant 2 : index
    %c5_71 = arith.constant 5 : index
    %41 = memref.load %arg5[%c2_70, %c5_71] : memref<12x6xf32, #tpu.memory_space<smem>>
    %c3_72 = arith.constant 3 : index
    %c0_73 = arith.constant 0 : index
    %42 = memref.load %arg5[%c3_72, %c0_73] : memref<12x6xf32, #tpu.memory_space<smem>>
    %c3_74 = arith.constant 3 : index
    %c1_75 = arith.constant 1 : index
    %43 = memref.load %arg5[%c3_74, %c1_75] : memref<12x6xf32, #tpu.memory_space<smem>>
    %c3_76 = arith.constant 3 : index
    %c2_77 = arith.constant 2 : index
    %44 = memref.load %arg5[%c3_76, %c2_77] : memref<12x6xf32, #tpu.memory_space<smem>>
    %c3_78 = arith.constant 3 : index
    %c3_79 = arith.constant 3 : index
    %45 = memref.load %arg5[%c3_78, %c3_79] : memref<12x6xf32, #tpu.memory_space<smem>>
    %c3_80 = arith.constant 3 : index
    %c4_81 = arith.constant 4 : index
    %46 = memref.load %arg5[%c3_80, %c4_81] : memref<12x6xf32, #tpu.memory_space<smem>>
    %c3_82 = arith.constant 3 : index
    %c5_83 = arith.constant 5 : index
    %47 = memref.load %arg5[%c3_82, %c5_83] : memref<12x6xf32, #tpu.memory_space<smem>>
    %c4_84 = arith.constant 4 : index
    %c0_85 = arith.constant 0 : index
    %48 = memref.load %arg5[%c4_84, %c0_85] : memref<12x6xf32, #tpu.memory_space<smem>>
    %c4_86 = arith.constant 4 : index
    %c1_87 = arith.constant 1 : index
    %49 = memref.load %arg5[%c4_86, %c1_87] : memref<12x6xf32, #tpu.memory_space<smem>>
    %c4_88 = arith.constant 4 : index
    %c2_89 = arith.constant 2 : index
    %50 = memref.load %arg5[%c4_88, %c2_89] : memref<12x6xf32, #tpu.memory_space<smem>>
    %c4_90 = arith.constant 4 : index
    %c3_91 = arith.constant 3 : index
    %51 = memref.load %arg5[%c4_90, %c3_91] : memref<12x6xf32, #tpu.memory_space<smem>>
    %c4_92 = arith.constant 4 : index
    %c4_93 = arith.constant 4 : index
    %52 = memref.load %arg5[%c4_92, %c4_93] : memref<12x6xf32, #tpu.memory_space<smem>>
    %c4_94 = arith.constant 4 : index
    %c5_95 = arith.constant 5 : index
    %53 = memref.load %arg5[%c4_94, %c5_95] : memref<12x6xf32, #tpu.memory_space<smem>>
    %c5_96 = arith.constant 5 : index
    %c0_97 = arith.constant 0 : index
    %54 = memref.load %arg5[%c5_96, %c0_97] : memref<12x6xf32, #tpu.memory_space<smem>>
    %c5_98 = arith.constant 5 : index
    %c1_99 = arith.constant 1 : index
    %55 = memref.load %arg5[%c5_98, %c1_99] : memref<12x6xf32, #tpu.memory_space<smem>>
    %c5_100 = arith.constant 5 : index
    %c2_101 = arith.constant 2 : index
    %56 = memref.load %arg5[%c5_100, %c2_101] : memref<12x6xf32, #tpu.memory_space<smem>>
    %c5_102 = arith.constant 5 : index
    %c3_103 = arith.constant 3 : index
    %57 = memref.load %arg5[%c5_102, %c3_103] : memref<12x6xf32, #tpu.memory_space<smem>>
    %c5_104 = arith.constant 5 : index
    %c4_105 = arith.constant 4 : index
    %58 = memref.load %arg5[%c5_104, %c4_105] : memref<12x6xf32, #tpu.memory_space<smem>>
    %c5_106 = arith.constant 5 : index
    %c5_107 = arith.constant 5 : index
    %59 = memref.load %arg5[%c5_106, %c5_107] : memref<12x6xf32, #tpu.memory_space<smem>>
    %c6 = arith.constant 6 : index
    %c0_108 = arith.constant 0 : index
    %60 = memref.load %arg5[%c6, %c0_108] : memref<12x6xf32, #tpu.memory_space<smem>>
    %c6_109 = arith.constant 6 : index
    %c1_110 = arith.constant 1 : index
    %61 = memref.load %arg5[%c6_109, %c1_110] : memref<12x6xf32, #tpu.memory_space<smem>>
    %c6_111 = arith.constant 6 : index
    %c2_112 = arith.constant 2 : index
    %62 = memref.load %arg5[%c6_111, %c2_112] : memref<12x6xf32, #tpu.memory_space<smem>>
    %c6_113 = arith.constant 6 : index
    %c3_114 = arith.constant 3 : index
    %63 = memref.load %arg5[%c6_113, %c3_114] : memref<12x6xf32, #tpu.memory_space<smem>>
    %c6_115 = arith.constant 6 : index
    %c4_116 = arith.constant 4 : index
    %64 = memref.load %arg5[%c6_115, %c4_116] : memref<12x6xf32, #tpu.memory_space<smem>>
    %c6_117 = arith.constant 6 : index
    %c5_118 = arith.constant 5 : index
    %65 = memref.load %arg5[%c6_117, %c5_118] : memref<12x6xf32, #tpu.memory_space<smem>>
    %c7 = arith.constant 7 : index
    %c0_119 = arith.constant 0 : index
    %66 = memref.load %arg5[%c7, %c0_119] : memref<12x6xf32, #tpu.memory_space<smem>>
    %c7_120 = arith.constant 7 : index
    %c1_121 = arith.constant 1 : index
    %67 = memref.load %arg5[%c7_120, %c1_121] : memref<12x6xf32, #tpu.memory_space<smem>>
    %c7_122 = arith.constant 7 : index
    %c2_123 = arith.constant 2 : index
    %68 = memref.load %arg5[%c7_122, %c2_123] : memref<12x6xf32, #tpu.memory_space<smem>>
    %c7_124 = arith.constant 7 : index
    %c3_125 = arith.constant 3 : index
    %69 = memref.load %arg5[%c7_124, %c3_125] : memref<12x6xf32, #tpu.memory_space<smem>>
    %c7_126 = arith.constant 7 : index
    %c4_127 = arith.constant 4 : index
    %70 = memref.load %arg5[%c7_126, %c4_127] : memref<12x6xf32, #tpu.memory_space<smem>>
    %c7_128 = arith.constant 7 : index
    %c5_129 = arith.constant 5 : index
    %71 = memref.load %arg5[%c7_128, %c5_129] : memref<12x6xf32, #tpu.memory_space<smem>>
    %c8 = arith.constant 8 : index
    %c0_130 = arith.constant 0 : index
    %72 = memref.load %arg5[%c8, %c0_130] : memref<12x6xf32, #tpu.memory_space<smem>>
    %c8_131 = arith.constant 8 : index
    %c1_132 = arith.constant 1 : index
    %73 = memref.load %arg5[%c8_131, %c1_132] : memref<12x6xf32, #tpu.memory_space<smem>>
    %c8_133 = arith.constant 8 : index
    %c2_134 = arith.constant 2 : index
    %74 = memref.load %arg5[%c8_133, %c2_134] : memref<12x6xf32, #tpu.memory_space<smem>>
    %c8_135 = arith.constant 8 : index
    %c3_136 = arith.constant 3 : index
    %75 = memref.load %arg5[%c8_135, %c3_136] : memref<12x6xf32, #tpu.memory_space<smem>>
    %c8_137 = arith.constant 8 : index
    %c4_138 = arith.constant 4 : index
    %76 = memref.load %arg5[%c8_137, %c4_138] : memref<12x6xf32, #tpu.memory_space<smem>>
    %c8_139 = arith.constant 8 : index
    %c5_140 = arith.constant 5 : index
    %77 = memref.load %arg5[%c8_139, %c5_140] : memref<12x6xf32, #tpu.memory_space<smem>>
    %c9 = arith.constant 9 : index
    %c0_141 = arith.constant 0 : index
    %78 = memref.load %arg5[%c9, %c0_141] : memref<12x6xf32, #tpu.memory_space<smem>>
    %c9_142 = arith.constant 9 : index
    %c1_143 = arith.constant 1 : index
    %79 = memref.load %arg5[%c9_142, %c1_143] : memref<12x6xf32, #tpu.memory_space<smem>>
    %c9_144 = arith.constant 9 : index
    %c2_145 = arith.constant 2 : index
    %80 = memref.load %arg5[%c9_144, %c2_145] : memref<12x6xf32, #tpu.memory_space<smem>>
    %c9_146 = arith.constant 9 : index
    %c3_147 = arith.constant 3 : index
    %81 = memref.load %arg5[%c9_146, %c3_147] : memref<12x6xf32, #tpu.memory_space<smem>>
    %c9_148 = arith.constant 9 : index
    %c4_149 = arith.constant 4 : index
    %82 = memref.load %arg5[%c9_148, %c4_149] : memref<12x6xf32, #tpu.memory_space<smem>>
    %c9_150 = arith.constant 9 : index
    %c5_151 = arith.constant 5 : index
    %83 = memref.load %arg5[%c9_150, %c5_151] : memref<12x6xf32, #tpu.memory_space<smem>>
    %c10 = arith.constant 10 : index
    %c0_152 = arith.constant 0 : index
    %84 = memref.load %arg5[%c10, %c0_152] : memref<12x6xf32, #tpu.memory_space<smem>>
    %c10_153 = arith.constant 10 : index
    %c1_154 = arith.constant 1 : index
    %85 = memref.load %arg5[%c10_153, %c1_154] : memref<12x6xf32, #tpu.memory_space<smem>>
    %c10_155 = arith.constant 10 : index
    %c2_156 = arith.constant 2 : index
    %86 = memref.load %arg5[%c10_155, %c2_156] : memref<12x6xf32, #tpu.memory_space<smem>>
    %c10_157 = arith.constant 10 : index
    %c3_158 = arith.constant 3 : index
    %87 = memref.load %arg5[%c10_157, %c3_158] : memref<12x6xf32, #tpu.memory_space<smem>>
    %c10_159 = arith.constant 10 : index
    %c4_160 = arith.constant 4 : index
    %88 = memref.load %arg5[%c10_159, %c4_160] : memref<12x6xf32, #tpu.memory_space<smem>>
    %c10_161 = arith.constant 10 : index
    %c5_162 = arith.constant 5 : index
    %89 = memref.load %arg5[%c10_161, %c5_162] : memref<12x6xf32, #tpu.memory_space<smem>>
    %c11 = arith.constant 11 : index
    %c0_163 = arith.constant 0 : index
    %90 = memref.load %arg5[%c11, %c0_163] : memref<12x6xf32, #tpu.memory_space<smem>>
    %c11_164 = arith.constant 11 : index
    %c1_165 = arith.constant 1 : index
    %91 = memref.load %arg5[%c11_164, %c1_165] : memref<12x6xf32, #tpu.memory_space<smem>>
    %c11_166 = arith.constant 11 : index
    %c2_167 = arith.constant 2 : index
    %92 = memref.load %arg5[%c11_166, %c2_167] : memref<12x6xf32, #tpu.memory_space<smem>>
    %c11_168 = arith.constant 11 : index
    %c3_169 = arith.constant 3 : index
    %93 = memref.load %arg5[%c11_168, %c3_169] : memref<12x6xf32, #tpu.memory_space<smem>>
    %c11_170 = arith.constant 11 : index
    %c4_171 = arith.constant 4 : index
    %94 = memref.load %arg5[%c11_170, %c4_171] : memref<12x6xf32, #tpu.memory_space<smem>>
    %c11_172 = arith.constant 11 : index
    %c5_173 = arith.constant 5 : index
    %95 = memref.load %arg5[%c11_172, %c5_173] : memref<12x6xf32, #tpu.memory_space<smem>>
    %c0_174 = arith.constant 0 : index
    %96 = memref.load %arg6[%c0_174] : memref<12xf32, #tpu.memory_space<smem>>
    %c1_175 = arith.constant 1 : index
    %97 = memref.load %arg6[%c1_175] : memref<12xf32, #tpu.memory_space<smem>>
    %c2_176 = arith.constant 2 : index
    %98 = memref.load %arg6[%c2_176] : memref<12xf32, #tpu.memory_space<smem>>
    %c3_177 = arith.constant 3 : index
    %99 = memref.load %arg6[%c3_177] : memref<12xf32, #tpu.memory_space<smem>>
    %c4_178 = arith.constant 4 : index
    %100 = memref.load %arg6[%c4_178] : memref<12xf32, #tpu.memory_space<smem>>
    %c5_179 = arith.constant 5 : index
    %101 = memref.load %arg6[%c5_179] : memref<12xf32, #tpu.memory_space<smem>>
    %c6_180 = arith.constant 6 : index
    %102 = memref.load %arg6[%c6_180] : memref<12xf32, #tpu.memory_space<smem>>
    %c7_181 = arith.constant 7 : index
    %103 = memref.load %arg6[%c7_181] : memref<12xf32, #tpu.memory_space<smem>>
    %c8_182 = arith.constant 8 : index
    %104 = memref.load %arg6[%c8_182] : memref<12xf32, #tpu.memory_space<smem>>
    %c9_183 = arith.constant 9 : index
    %105 = memref.load %arg6[%c9_183] : memref<12xf32, #tpu.memory_space<smem>>
    %c10_184 = arith.constant 10 : index
    %106 = memref.load %arg6[%c10_184] : memref<12xf32, #tpu.memory_space<smem>>
    %c11_185 = arith.constant 11 : index
    %107 = memref.load %arg6[%c11_185] : memref<12xf32, #tpu.memory_space<smem>>
    %c0_186 = arith.constant 0 : index
    %c0_187 = arith.constant 0 : index
    %108 = memref.load %arg7[%c0_186, %c0_187] : memref<1x12xf32, #tpu.memory_space<smem>>
    %c0_188 = arith.constant 0 : index
    %c1_189 = arith.constant 1 : index
    %109 = memref.load %arg7[%c0_188, %c1_189] : memref<1x12xf32, #tpu.memory_space<smem>>
    %c0_190 = arith.constant 0 : index
    %c2_191 = arith.constant 2 : index
    %110 = memref.load %arg7[%c0_190, %c2_191] : memref<1x12xf32, #tpu.memory_space<smem>>
    %c0_192 = arith.constant 0 : index
    %c3_193 = arith.constant 3 : index
    %111 = memref.load %arg7[%c0_192, %c3_193] : memref<1x12xf32, #tpu.memory_space<smem>>
    %c0_194 = arith.constant 0 : index
    %c4_195 = arith.constant 4 : index
    %112 = memref.load %arg7[%c0_194, %c4_195] : memref<1x12xf32, #tpu.memory_space<smem>>
    %c0_196 = arith.constant 0 : index
    %c5_197 = arith.constant 5 : index
    %113 = memref.load %arg7[%c0_196, %c5_197] : memref<1x12xf32, #tpu.memory_space<smem>>
    %c0_198 = arith.constant 0 : index
    %c6_199 = arith.constant 6 : index
    %114 = memref.load %arg7[%c0_198, %c6_199] : memref<1x12xf32, #tpu.memory_space<smem>>
    %c0_200 = arith.constant 0 : index
    %c7_201 = arith.constant 7 : index
    %115 = memref.load %arg7[%c0_200, %c7_201] : memref<1x12xf32, #tpu.memory_space<smem>>
    %c0_202 = arith.constant 0 : index
    %c8_203 = arith.constant 8 : index
    %116 = memref.load %arg7[%c0_202, %c8_203] : memref<1x12xf32, #tpu.memory_space<smem>>
    %c0_204 = arith.constant 0 : index
    %c9_205 = arith.constant 9 : index
    %117 = memref.load %arg7[%c0_204, %c9_205] : memref<1x12xf32, #tpu.memory_space<smem>>
    %c0_206 = arith.constant 0 : index
    %c10_207 = arith.constant 10 : index
    %118 = memref.load %arg7[%c0_206, %c10_207] : memref<1x12xf32, #tpu.memory_space<smem>>
    %c0_208 = arith.constant 0 : index
    %c11_209 = arith.constant 11 : index
    %119 = memref.load %arg7[%c0_208, %c11_209] : memref<1x12xf32, #tpu.memory_space<smem>>
    %c0_210 = arith.constant 0 : index
    %120 = memref.load %arg8[%c0_210] : memref<1xf32, #tpu.memory_space<smem>>
    %c0_i32 = arith.constant 0 : i32
    %c8_i32 = arith.constant 8 : i32
    %121 = arith.muli %c0_i32, %c8_i32 : i32
    %122 = tpu.assume_multiple %121, 8 : i32
    %c0_211 = arith.constant 0 : index
    %c0_212 = arith.constant 0 : index
    %123 = arith.index_cast %122 : i32 to index
    %c0_213 = arith.constant 0 : index
    %124 = vector.load %arg2[%c0_211, %c0_212, %123, %c0_213] : memref<1x3x8x128xf32, #tpu.memory_space<vmem>>, vector<1x1x8x128xf32>
    %125 = vector.shape_cast %124 : vector<1x1x8x128xf32> to vector<8x128xf32>
    %c0_214 = arith.constant 0 : index
    %c1_215 = arith.constant 1 : index
    %126 = arith.index_cast %122 : i32 to index
    %c0_216 = arith.constant 0 : index
    %127 = vector.load %arg2[%c0_214, %c1_215, %126, %c0_216] : memref<1x3x8x128xf32, #tpu.memory_space<vmem>>, vector<1x1x8x128xf32>
    %128 = vector.shape_cast %127 : vector<1x1x8x128xf32> to vector<8x128xf32>
    %c0_217 = arith.constant 0 : index
    %c2_218 = arith.constant 2 : index
    %129 = arith.index_cast %122 : i32 to index
    %c0_219 = arith.constant 0 : index
    %130 = vector.load %arg2[%c0_217, %c2_218, %129, %c0_219] : memref<1x3x8x128xf32, #tpu.memory_space<vmem>>, vector<1x1x8x128xf32>
    %131 = vector.shape_cast %130 : vector<1x1x8x128xf32> to vector<8x128xf32>
    %132 = vector.broadcast %18 : f32 to vector<8x128xf32>
    %133 = vector.broadcast %0 : f32 to vector<8x128xf32>
    %134 = arith.mulf %125, %133 : vector<8x128xf32>
    %135 = arith.addf %132, %134 : vector<8x128xf32>
    %136 = vector.broadcast %1 : f32 to vector<8x128xf32>
    %137 = arith.mulf %128, %136 : vector<8x128xf32>
    %138 = arith.addf %135, %137 : vector<8x128xf32>
    %139 = vector.broadcast %2 : f32 to vector<8x128xf32>
    %140 = arith.mulf %131, %139 : vector<8x128xf32>
    %141 = arith.addf %138, %140 : vector<8x128xf32>
    %142 = arith.mulf %141, %141 : vector<8x128xf32>
    %143 = arith.mulf %141, %142 : vector<8x128xf32>
    %cst = arith.constant 4.471500e-02 : f32
    %144 = vector.broadcast %cst : f32 to vector<8x128xf32>
    %145 = arith.mulf %144, %143 : vector<8x128xf32>
    %146 = arith.addf %141, %145 : vector<8x128xf32>
    %cst_220 = arith.constant 0.797884583 : f32
    %147 = vector.broadcast %cst_220 : f32 to vector<8x128xf32>
    %148 = arith.mulf %147, %146 : vector<8x128xf32>
    %149 = math.tanh %148 : vector<8x128xf32>
    %cst_221 = arith.constant 1.000000e+00 : f32
    %150 = vector.broadcast %cst_221 : f32 to vector<8x128xf32>
    %151 = arith.addf %150, %149 : vector<8x128xf32>
    %cst_222 = arith.constant 5.000000e-01 : f32
    %152 = vector.broadcast %cst_222 : f32 to vector<8x128xf32>
    %153 = arith.mulf %152, %151 : vector<8x128xf32>
    %154 = arith.mulf %141, %153 : vector<8x128xf32>
    %155 = vector.broadcast %19 : f32 to vector<8x128xf32>
    %156 = vector.broadcast %3 : f32 to vector<8x128xf32>
    %157 = arith.mulf %125, %156 : vector<8x128xf32>
    %158 = arith.addf %155, %157 : vector<8x128xf32>
    %159 = vector.broadcast %4 : f32 to vector<8x128xf32>
    %160 = arith.mulf %128, %159 : vector<8x128xf32>
    %161 = arith.addf %158, %160 : vector<8x128xf32>
    %162 = vector.broadcast %5 : f32 to vector<8x128xf32>
    %163 = arith.mulf %131, %162 : vector<8x128xf32>
    %164 = arith.addf %161, %163 : vector<8x128xf32>
    %165 = arith.mulf %164, %164 : vector<8x128xf32>
    %166 = arith.mulf %164, %165 : vector<8x128xf32>
    %cst_223 = arith.constant 4.471500e-02 : f32
    %167 = vector.broadcast %cst_223 : f32 to vector<8x128xf32>
    %168 = arith.mulf %167, %166 : vector<8x128xf32>
    %169 = arith.addf %164, %168 : vector<8x128xf32>
    %cst_224 = arith.constant 0.797884583 : f32
    %170 = vector.broadcast %cst_224 : f32 to vector<8x128xf32>
    %171 = arith.mulf %170, %169 : vector<8x128xf32>
    %172 = math.tanh %171 : vector<8x128xf32>
    %cst_225 = arith.constant 1.000000e+00 : f32
    %173 = vector.broadcast %cst_225 : f32 to vector<8x128xf32>
    %174 = arith.addf %173, %172 : vector<8x128xf32>
    %cst_226 = arith.constant 5.000000e-01 : f32
    %175 = vector.broadcast %cst_226 : f32 to vector<8x128xf32>
    %176 = arith.mulf %175, %174 : vector<8x128xf32>
    %177 = arith.mulf %164, %176 : vector<8x128xf32>
    %178 = vector.broadcast %20 : f32 to vector<8x128xf32>
    %179 = vector.broadcast %6 : f32 to vector<8x128xf32>
    %180 = arith.mulf %125, %179 : vector<8x128xf32>
    %181 = arith.addf %178, %180 : vector<8x128xf32>
    %182 = vector.broadcast %7 : f32 to vector<8x128xf32>
    %183 = arith.mulf %128, %182 : vector<8x128xf32>
    %184 = arith.addf %181, %183 : vector<8x128xf32>
    %185 = vector.broadcast %8 : f32 to vector<8x128xf32>
    %186 = arith.mulf %131, %185 : vector<8x128xf32>
    %187 = arith.addf %184, %186 : vector<8x128xf32>
    %188 = arith.mulf %187, %187 : vector<8x128xf32>
    %189 = arith.mulf %187, %188 : vector<8x128xf32>
    %cst_227 = arith.constant 4.471500e-02 : f32
    %190 = vector.broadcast %cst_227 : f32 to vector<8x128xf32>
    %191 = arith.mulf %190, %189 : vector<8x128xf32>
    %192 = arith.addf %187, %191 : vector<8x128xf32>
    %cst_228 = arith.constant 0.797884583 : f32
    %193 = vector.broadcast %cst_228 : f32 to vector<8x128xf32>
    %194 = arith.mulf %193, %192 : vector<8x128xf32>
    %195 = math.tanh %194 : vector<8x128xf32>
    %cst_229 = arith.constant 1.000000e+00 : f32
    %196 = vector.broadcast %cst_229 : f32 to vector<8x128xf32>
    %197 = arith.addf %196, %195 : vector<8x128xf32>
    %cst_230 = arith.constant 5.000000e-01 : f32
    %198 = vector.broadcast %cst_230 : f32 to vector<8x128xf32>
    %199 = arith.mulf %198, %197 : vector<8x128xf32>
    %200 = arith.mulf %187, %199 : vector<8x128xf32>
    %201 = vector.broadcast %21 : f32 to vector<8x128xf32>
    %202 = vector.broadcast %9 : f32 to vector<8x128xf32>
    %203 = arith.mulf %125, %202 : vector<8x128xf32>
    %204 = arith.addf %201, %203 : vector<8x128xf32>
    %205 = vector.broadcast %10 : f32 to vector<8x128xf32>
    %206 = arith.mulf %128, %205 : vector<8x128xf32>
    %207 = arith.addf %204, %206 : vector<8x128xf32>
    %208 = vector.broadcast %11 : f32 to vector<8x128xf32>
    %209 = arith.mulf %131, %208 : vector<8x128xf32>
    %210 = arith.addf %207, %209 : vector<8x128xf32>
    %211 = arith.mulf %210, %210 : vector<8x128xf32>
    %212 = arith.mulf %210, %211 : vector<8x128xf32>
    %cst_231 = arith.constant 4.471500e-02 : f32
    %213 = vector.broadcast %cst_231 : f32 to vector<8x128xf32>
    %214 = arith.mulf %213, %212 : vector<8x128xf32>
    %215 = arith.addf %210, %214 : vector<8x128xf32>
    %cst_232 = arith.constant 0.797884583 : f32
    %216 = vector.broadcast %cst_232 : f32 to vector<8x128xf32>
    %217 = arith.mulf %216, %215 : vector<8x128xf32>
    %218 = math.tanh %217 : vector<8x128xf32>
    %cst_233 = arith.constant 1.000000e+00 : f32
    %219 = vector.broadcast %cst_233 : f32 to vector<8x128xf32>
    %220 = arith.addf %219, %218 : vector<8x128xf32>
    %cst_234 = arith.constant 5.000000e-01 : f32
    %221 = vector.broadcast %cst_234 : f32 to vector<8x128xf32>
    %222 = arith.mulf %221, %220 : vector<8x128xf32>
    %223 = arith.mulf %210, %222 : vector<8x128xf32>
    %224 = vector.broadcast %22 : f32 to vector<8x128xf32>
    %225 = vector.broadcast %12 : f32 to vector<8x128xf32>
    %226 = arith.mulf %125, %225 : vector<8x128xf32>
    %227 = arith.addf %224, %226 : vector<8x128xf32>
    %228 = vector.broadcast %13 : f32 to vector<8x128xf32>
    %229 = arith.mulf %128, %228 : vector<8x128xf32>
    %230 = arith.addf %227, %229 : vector<8x128xf32>
    %231 = vector.broadcast %14 : f32 to vector<8x128xf32>
    %232 = arith.mulf %131, %231 : vector<8x128xf32>
    %233 = arith.addf %230, %232 : vector<8x128xf32>
    %234 = arith.mulf %233, %233 : vector<8x128xf32>
    %235 = arith.mulf %233, %234 : vector<8x128xf32>
    %cst_235 = arith.constant 4.471500e-02 : f32
    %236 = vector.broadcast %cst_235 : f32 to vector<8x128xf32>
    %237 = arith.mulf %236, %235 : vector<8x128xf32>
    %238 = arith.addf %233, %237 : vector<8x128xf32>
    %cst_236 = arith.constant 0.797884583 : f32
    %239 = vector.broadcast %cst_236 : f32 to vector<8x128xf32>
    %240 = arith.mulf %239, %238 : vector<8x128xf32>
    %241 = math.tanh %240 : vector<8x128xf32>
    %cst_237 = arith.constant 1.000000e+00 : f32
    %242 = vector.broadcast %cst_237 : f32 to vector<8x128xf32>
    %243 = arith.addf %242, %241 : vector<8x128xf32>
    %cst_238 = arith.constant 5.000000e-01 : f32
    %244 = vector.broadcast %cst_238 : f32 to vector<8x128xf32>
    %245 = arith.mulf %244, %243 : vector<8x128xf32>
    %246 = arith.mulf %233, %245 : vector<8x128xf32>
    %247 = vector.broadcast %23 : f32 to vector<8x128xf32>
    %248 = vector.broadcast %15 : f32 to vector<8x128xf32>
    %249 = arith.mulf %125, %248 : vector<8x128xf32>
    %250 = arith.addf %247, %249 : vector<8x128xf32>
    %251 = vector.broadcast %16 : f32 to vector<8x128xf32>
    %252 = arith.mulf %128, %251 : vector<8x128xf32>
    %253 = arith.addf %250, %252 : vector<8x128xf32>
    %254 = vector.broadcast %17 : f32 to vector<8x128xf32>
    %255 = arith.mulf %131, %254 : vector<8x128xf32>
    %256 = arith.addf %253, %255 : vector<8x128xf32>
    %257 = arith.mulf %256, %256 : vector<8x128xf32>
    %258 = arith.mulf %256, %257 : vector<8x128xf32>
    %cst_239 = arith.constant 4.471500e-02 : f32
    %259 = vector.broadcast %cst_239 : f32 to vector<8x128xf32>
    %260 = arith.mulf %259, %258 : vector<8x128xf32>
    %261 = arith.addf %256, %260 : vector<8x128xf32>
    %cst_240 = arith.constant 0.797884583 : f32
    %262 = vector.broadcast %cst_240 : f32 to vector<8x128xf32>
    %263 = arith.mulf %262, %261 : vector<8x128xf32>
    %264 = math.tanh %263 : vector<8x128xf32>
    %cst_241 = arith.constant 1.000000e+00 : f32
    %265 = vector.broadcast %cst_241 : f32 to vector<8x128xf32>
    %266 = arith.addf %265, %264 : vector<8x128xf32>
    %cst_242 = arith.constant 5.000000e-01 : f32
    %267 = vector.broadcast %cst_242 : f32 to vector<8x128xf32>
    %268 = arith.mulf %267, %266 : vector<8x128xf32>
    %269 = arith.mulf %256, %268 : vector<8x128xf32>
    %270 = vector.broadcast %120 : f32 to vector<8x128xf32>
    %271 = vector.broadcast %96 : f32 to vector<8x128xf32>
    %272 = vector.broadcast %24 : f32 to vector<8x128xf32>
    %273 = arith.mulf %154, %272 : vector<8x128xf32>
    %274 = arith.addf %271, %273 : vector<8x128xf32>
    %275 = vector.broadcast %25 : f32 to vector<8x128xf32>
    %276 = arith.mulf %177, %275 : vector<8x128xf32>
    %277 = arith.addf %274, %276 : vector<8x128xf32>
    %278 = vector.broadcast %26 : f32 to vector<8x128xf32>
    %279 = arith.mulf %200, %278 : vector<8x128xf32>
    %280 = arith.addf %277, %279 : vector<8x128xf32>
    %281 = vector.broadcast %27 : f32 to vector<8x128xf32>
    %282 = arith.mulf %223, %281 : vector<8x128xf32>
    %283 = arith.addf %280, %282 : vector<8x128xf32>
    %284 = vector.broadcast %28 : f32 to vector<8x128xf32>
    %285 = arith.mulf %246, %284 : vector<8x128xf32>
    %286 = arith.addf %283, %285 : vector<8x128xf32>
    %287 = vector.broadcast %29 : f32 to vector<8x128xf32>
    %288 = arith.mulf %269, %287 : vector<8x128xf32>
    %289 = arith.addf %286, %288 : vector<8x128xf32>
    %290 = arith.mulf %289, %289 : vector<8x128xf32>
    %291 = arith.mulf %289, %290 : vector<8x128xf32>
    %cst_243 = arith.constant 4.471500e-02 : f32
    %292 = vector.broadcast %cst_243 : f32 to vector<8x128xf32>
    %293 = arith.mulf %292, %291 : vector<8x128xf32>
    %294 = arith.addf %289, %293 : vector<8x128xf32>
    %cst_244 = arith.constant 0.797884583 : f32
    %295 = vector.broadcast %cst_244 : f32 to vector<8x128xf32>
    %296 = arith.mulf %295, %294 : vector<8x128xf32>
    %297 = math.tanh %296 : vector<8x128xf32>
    %cst_245 = arith.constant 1.000000e+00 : f32
    %298 = vector.broadcast %cst_245 : f32 to vector<8x128xf32>
    %299 = arith.addf %298, %297 : vector<8x128xf32>
    %cst_246 = arith.constant 5.000000e-01 : f32
    %300 = vector.broadcast %cst_246 : f32 to vector<8x128xf32>
    %301 = arith.mulf %300, %299 : vector<8x128xf32>
    %302 = arith.mulf %289, %301 : vector<8x128xf32>
    %303 = vector.broadcast %108 : f32 to vector<8x128xf32>
    %304 = arith.mulf %302, %303 : vector<8x128xf32>
    %305 = arith.addf %270, %304 : vector<8x128xf32>
    %306 = vector.broadcast %97 : f32 to vector<8x128xf32>
    %307 = vector.broadcast %30 : f32 to vector<8x128xf32>
    %308 = arith.mulf %154, %307 : vector<8x128xf32>
    %309 = arith.addf %306, %308 : vector<8x128xf32>
    %310 = vector.broadcast %31 : f32 to vector<8x128xf32>
    %311 = arith.mulf %177, %310 : vector<8x128xf32>
    %312 = arith.addf %309, %311 : vector<8x128xf32>
    %313 = vector.broadcast %32 : f32 to vector<8x128xf32>
    %314 = arith.mulf %200, %313 : vector<8x128xf32>
    %315 = arith.addf %312, %314 : vector<8x128xf32>
    %316 = vector.broadcast %33 : f32 to vector<8x128xf32>
    %317 = arith.mulf %223, %316 : vector<8x128xf32>
    %318 = arith.addf %315, %317 : vector<8x128xf32>
    %319 = vector.broadcast %34 : f32 to vector<8x128xf32>
    %320 = arith.mulf %246, %319 : vector<8x128xf32>
    %321 = arith.addf %318, %320 : vector<8x128xf32>
    %322 = vector.broadcast %35 : f32 to vector<8x128xf32>
    %323 = arith.mulf %269, %322 : vector<8x128xf32>
    %324 = arith.addf %321, %323 : vector<8x128xf32>
    %325 = arith.mulf %324, %324 : vector<8x128xf32>
    %326 = arith.mulf %324, %325 : vector<8x128xf32>
    %cst_247 = arith.constant 4.471500e-02 : f32
    %327 = vector.broadcast %cst_247 : f32 to vector<8x128xf32>
    %328 = arith.mulf %327, %326 : vector<8x128xf32>
    %329 = arith.addf %324, %328 : vector<8x128xf32>
    %cst_248 = arith.constant 0.797884583 : f32
    %330 = vector.broadcast %cst_248 : f32 to vector<8x128xf32>
    %331 = arith.mulf %330, %329 : vector<8x128xf32>
    %332 = math.tanh %331 : vector<8x128xf32>
    %cst_249 = arith.constant 1.000000e+00 : f32
    %333 = vector.broadcast %cst_249 : f32 to vector<8x128xf32>
    %334 = arith.addf %333, %332 : vector<8x128xf32>
    %cst_250 = arith.constant 5.000000e-01 : f32
    %335 = vector.broadcast %cst_250 : f32 to vector<8x128xf32>
    %336 = arith.mulf %335, %334 : vector<8x128xf32>
    %337 = arith.mulf %324, %336 : vector<8x128xf32>
    %338 = vector.broadcast %109 : f32 to vector<8x128xf32>
    %339 = arith.mulf %337, %338 : vector<8x128xf32>
    %340 = arith.addf %305, %339 : vector<8x128xf32>
    %341 = vector.broadcast %98 : f32 to vector<8x128xf32>
    %342 = vector.broadcast %36 : f32 to vector<8x128xf32>
    %343 = arith.mulf %154, %342 : vector<8x128xf32>
    %344 = arith.addf %341, %343 : vector<8x128xf32>
    %345 = vector.broadcast %37 : f32 to vector<8x128xf32>
    %346 = arith.mulf %177, %345 : vector<8x128xf32>
    %347 = arith.addf %344, %346 : vector<8x128xf32>
    %348 = vector.broadcast %38 : f32 to vector<8x128xf32>
    %349 = arith.mulf %200, %348 : vector<8x128xf32>
    %350 = arith.addf %347, %349 : vector<8x128xf32>
    %351 = vector.broadcast %39 : f32 to vector<8x128xf32>
    %352 = arith.mulf %223, %351 : vector<8x128xf32>
    %353 = arith.addf %350, %352 : vector<8x128xf32>
    %354 = vector.broadcast %40 : f32 to vector<8x128xf32>
    %355 = arith.mulf %246, %354 : vector<8x128xf32>
    %356 = arith.addf %353, %355 : vector<8x128xf32>
    %357 = vector.broadcast %41 : f32 to vector<8x128xf32>
    %358 = arith.mulf %269, %357 : vector<8x128xf32>
    %359 = arith.addf %356, %358 : vector<8x128xf32>
    %360 = arith.mulf %359, %359 : vector<8x128xf32>
    %361 = arith.mulf %359, %360 : vector<8x128xf32>
    %cst_251 = arith.constant 4.471500e-02 : f32
    %362 = vector.broadcast %cst_251 : f32 to vector<8x128xf32>
    %363 = arith.mulf %362, %361 : vector<8x128xf32>
    %364 = arith.addf %359, %363 : vector<8x128xf32>
    %cst_252 = arith.constant 0.797884583 : f32
    %365 = vector.broadcast %cst_252 : f32 to vector<8x128xf32>
    %366 = arith.mulf %365, %364 : vector<8x128xf32>
    %367 = math.tanh %366 : vector<8x128xf32>
    %cst_253 = arith.constant 1.000000e+00 : f32
    %368 = vector.broadcast %cst_253 : f32 to vector<8x128xf32>
    %369 = arith.addf %368, %367 : vector<8x128xf32>
    %cst_254 = arith.constant 5.000000e-01 : f32
    %370 = vector.broadcast %cst_254 : f32 to vector<8x128xf32>
    %371 = arith.mulf %370, %369 : vector<8x128xf32>
    %372 = arith.mulf %359, %371 : vector<8x128xf32>
    %373 = vector.broadcast %110 : f32 to vector<8x128xf32>
    %374 = arith.mulf %372, %373 : vector<8x128xf32>
    %375 = arith.addf %340, %374 : vector<8x128xf32>
    %376 = vector.broadcast %99 : f32 to vector<8x128xf32>
    %377 = vector.broadcast %42 : f32 to vector<8x128xf32>
    %378 = arith.mulf %154, %377 : vector<8x128xf32>
    %379 = arith.addf %376, %378 : vector<8x128xf32>
    %380 = vector.broadcast %43 : f32 to vector<8x128xf32>
    %381 = arith.mulf %177, %380 : vector<8x128xf32>
    %382 = arith.addf %379, %381 : vector<8x128xf32>
    %383 = vector.broadcast %44 : f32 to vector<8x128xf32>
    %384 = arith.mulf %200, %383 : vector<8x128xf32>
    %385 = arith.addf %382, %384 : vector<8x128xf32>
    %386 = vector.broadcast %45 : f32 to vector<8x128xf32>
    %387 = arith.mulf %223, %386 : vector<8x128xf32>
    %388 = arith.addf %385, %387 : vector<8x128xf32>
    %389 = vector.broadcast %46 : f32 to vector<8x128xf32>
    %390 = arith.mulf %246, %389 : vector<8x128xf32>
    %391 = arith.addf %388, %390 : vector<8x128xf32>
    %392 = vector.broadcast %47 : f32 to vector<8x128xf32>
    %393 = arith.mulf %269, %392 : vector<8x128xf32>
    %394 = arith.addf %391, %393 : vector<8x128xf32>
    %395 = arith.mulf %394, %394 : vector<8x128xf32>
    %396 = arith.mulf %394, %395 : vector<8x128xf32>
    %cst_255 = arith.constant 4.471500e-02 : f32
    %397 = vector.broadcast %cst_255 : f32 to vector<8x128xf32>
    %398 = arith.mulf %397, %396 : vector<8x128xf32>
    %399 = arith.addf %394, %398 : vector<8x128xf32>
    %cst_256 = arith.constant 0.797884583 : f32
    %400 = vector.broadcast %cst_256 : f32 to vector<8x128xf32>
    %401 = arith.mulf %400, %399 : vector<8x128xf32>
    %402 = math.tanh %401 : vector<8x128xf32>
    %cst_257 = arith.constant 1.000000e+00 : f32
    %403 = vector.broadcast %cst_257 : f32 to vector<8x128xf32>
    %404 = arith.addf %403, %402 : vector<8x128xf32>
    %cst_258 = arith.constant 5.000000e-01 : f32
    %405 = vector.broadcast %cst_258 : f32 to vector<8x128xf32>
    %406 = arith.mulf %405, %404 : vector<8x128xf32>
    %407 = arith.mulf %394, %406 : vector<8x128xf32>
    %408 = vector.broadcast %111 : f32 to vector<8x128xf32>
    %409 = arith.mulf %407, %408 : vector<8x128xf32>
    %410 = arith.addf %375, %409 : vector<8x128xf32>
    %411 = vector.broadcast %100 : f32 to vector<8x128xf32>
    %412 = vector.broadcast %48 : f32 to vector<8x128xf32>
    %413 = arith.mulf %154, %412 : vector<8x128xf32>
    %414 = arith.addf %411, %413 : vector<8x128xf32>
    %415 = vector.broadcast %49 : f32 to vector<8x128xf32>
    %416 = arith.mulf %177, %415 : vector<8x128xf32>
    %417 = arith.addf %414, %416 : vector<8x128xf32>
    %418 = vector.broadcast %50 : f32 to vector<8x128xf32>
    %419 = arith.mulf %200, %418 : vector<8x128xf32>
    %420 = arith.addf %417, %419 : vector<8x128xf32>
    %421 = vector.broadcast %51 : f32 to vector<8x128xf32>
    %422 = arith.mulf %223, %421 : vector<8x128xf32>
    %423 = arith.addf %420, %422 : vector<8x128xf32>
    %424 = vector.broadcast %52 : f32 to vector<8x128xf32>
    %425 = arith.mulf %246, %424 : vector<8x128xf32>
    %426 = arith.addf %423, %425 : vector<8x128xf32>
    %427 = vector.broadcast %53 : f32 to vector<8x128xf32>
    %428 = arith.mulf %269, %427 : vector<8x128xf32>
    %429 = arith.addf %426, %428 : vector<8x128xf32>
    %430 = arith.mulf %429, %429 : vector<8x128xf32>
    %431 = arith.mulf %429, %430 : vector<8x128xf32>
    %cst_259 = arith.constant 4.471500e-02 : f32
    %432 = vector.broadcast %cst_259 : f32 to vector<8x128xf32>
    %433 = arith.mulf %432, %431 : vector<8x128xf32>
    %434 = arith.addf %429, %433 : vector<8x128xf32>
    %cst_260 = arith.constant 0.797884583 : f32
    %435 = vector.broadcast %cst_260 : f32 to vector<8x128xf32>
    %436 = arith.mulf %435, %434 : vector<8x128xf32>
    %437 = math.tanh %436 : vector<8x128xf32>
    %cst_261 = arith.constant 1.000000e+00 : f32
    %438 = vector.broadcast %cst_261 : f32 to vector<8x128xf32>
    %439 = arith.addf %438, %437 : vector<8x128xf32>
    %cst_262 = arith.constant 5.000000e-01 : f32
    %440 = vector.broadcast %cst_262 : f32 to vector<8x128xf32>
    %441 = arith.mulf %440, %439 : vector<8x128xf32>
    %442 = arith.mulf %429, %441 : vector<8x128xf32>
    %443 = vector.broadcast %112 : f32 to vector<8x128xf32>
    %444 = arith.mulf %442, %443 : vector<8x128xf32>
    %445 = arith.addf %410, %444 : vector<8x128xf32>
    %446 = vector.broadcast %101 : f32 to vector<8x128xf32>
    %447 = vector.broadcast %54 : f32 to vector<8x128xf32>
    %448 = arith.mulf %154, %447 : vector<8x128xf32>
    %449 = arith.addf %446, %448 : vector<8x128xf32>
    %450 = vector.broadcast %55 : f32 to vector<8x128xf32>
    %451 = arith.mulf %177, %450 : vector<8x128xf32>
    %452 = arith.addf %449, %451 : vector<8x128xf32>
    %453 = vector.broadcast %56 : f32 to vector<8x128xf32>
    %454 = arith.mulf %200, %453 : vector<8x128xf32>
    %455 = arith.addf %452, %454 : vector<8x128xf32>
    %456 = vector.broadcast %57 : f32 to vector<8x128xf32>
    %457 = arith.mulf %223, %456 : vector<8x128xf32>
    %458 = arith.addf %455, %457 : vector<8x128xf32>
    %459 = vector.broadcast %58 : f32 to vector<8x128xf32>
    %460 = arith.mulf %246, %459 : vector<8x128xf32>
    %461 = arith.addf %458, %460 : vector<8x128xf32>
    %462 = vector.broadcast %59 : f32 to vector<8x128xf32>
    %463 = arith.mulf %269, %462 : vector<8x128xf32>
    %464 = arith.addf %461, %463 : vector<8x128xf32>
    %465 = arith.mulf %464, %464 : vector<8x128xf32>
    %466 = arith.mulf %464, %465 : vector<8x128xf32>
    %cst_263 = arith.constant 4.471500e-02 : f32
    %467 = vector.broadcast %cst_263 : f32 to vector<8x128xf32>
    %468 = arith.mulf %467, %466 : vector<8x128xf32>
    %469 = arith.addf %464, %468 : vector<8x128xf32>
    %cst_264 = arith.constant 0.797884583 : f32
    %470 = vector.broadcast %cst_264 : f32 to vector<8x128xf32>
    %471 = arith.mulf %470, %469 : vector<8x128xf32>
    %472 = math.tanh %471 : vector<8x128xf32>
    %cst_265 = arith.constant 1.000000e+00 : f32
    %473 = vector.broadcast %cst_265 : f32 to vector<8x128xf32>
    %474 = arith.addf %473, %472 : vector<8x128xf32>
    %cst_266 = arith.constant 5.000000e-01 : f32
    %475 = vector.broadcast %cst_266 : f32 to vector<8x128xf32>
    %476 = arith.mulf %475, %474 : vector<8x128xf32>
    %477 = arith.mulf %464, %476 : vector<8x128xf32>
    %478 = vector.broadcast %113 : f32 to vector<8x128xf32>
    %479 = arith.mulf %477, %478 : vector<8x128xf32>
    %480 = arith.addf %445, %479 : vector<8x128xf32>
    %481 = vector.broadcast %102 : f32 to vector<8x128xf32>
    %482 = vector.broadcast %60 : f32 to vector<8x128xf32>
    %483 = arith.mulf %154, %482 : vector<8x128xf32>
    %484 = arith.addf %481, %483 : vector<8x128xf32>
    %485 = vector.broadcast %61 : f32 to vector<8x128xf32>
    %486 = arith.mulf %177, %485 : vector<8x128xf32>
    %487 = arith.addf %484, %486 : vector<8x128xf32>
    %488 = vector.broadcast %62 : f32 to vector<8x128xf32>
    %489 = arith.mulf %200, %488 : vector<8x128xf32>
    %490 = arith.addf %487, %489 : vector<8x128xf32>
    %491 = vector.broadcast %63 : f32 to vector<8x128xf32>
    %492 = arith.mulf %223, %491 : vector<8x128xf32>
    %493 = arith.addf %490, %492 : vector<8x128xf32>
    %494 = vector.broadcast %64 : f32 to vector<8x128xf32>
    %495 = arith.mulf %246, %494 : vector<8x128xf32>
    %496 = arith.addf %493, %495 : vector<8x128xf32>
    %497 = vector.broadcast %65 : f32 to vector<8x128xf32>
    %498 = arith.mulf %269, %497 : vector<8x128xf32>
    %499 = arith.addf %496, %498 : vector<8x128xf32>
    %500 = arith.mulf %499, %499 : vector<8x128xf32>
    %501 = arith.mulf %499, %500 : vector<8x128xf32>
    %cst_267 = arith.constant 4.471500e-02 : f32
    %502 = vector.broadcast %cst_267 : f32 to vector<8x128xf32>
    %503 = arith.mulf %502, %501 : vector<8x128xf32>
    %504 = arith.addf %499, %503 : vector<8x128xf32>
    %cst_268 = arith.constant 0.797884583 : f32
    %505 = vector.broadcast %cst_268 : f32 to vector<8x128xf32>
    %506 = arith.mulf %505, %504 : vector<8x128xf32>
    %507 = math.tanh %506 : vector<8x128xf32>
    %cst_269 = arith.constant 1.000000e+00 : f32
    %508 = vector.broadcast %cst_269 : f32 to vector<8x128xf32>
    %509 = arith.addf %508, %507 : vector<8x128xf32>
    %cst_270 = arith.constant 5.000000e-01 : f32
    %510 = vector.broadcast %cst_270 : f32 to vector<8x128xf32>
    %511 = arith.mulf %510, %509 : vector<8x128xf32>
    %512 = arith.mulf %499, %511 : vector<8x128xf32>
    %513 = vector.broadcast %114 : f32 to vector<8x128xf32>
    %514 = arith.mulf %512, %513 : vector<8x128xf32>
    %515 = arith.addf %480, %514 : vector<8x128xf32>
    %516 = vector.broadcast %103 : f32 to vector<8x128xf32>
    %517 = vector.broadcast %66 : f32 to vector<8x128xf32>
    %518 = arith.mulf %154, %517 : vector<8x128xf32>
    %519 = arith.addf %516, %518 : vector<8x128xf32>
    %520 = vector.broadcast %67 : f32 to vector<8x128xf32>
    %521 = arith.mulf %177, %520 : vector<8x128xf32>
    %522 = arith.addf %519, %521 : vector<8x128xf32>
    %523 = vector.broadcast %68 : f32 to vector<8x128xf32>
    %524 = arith.mulf %200, %523 : vector<8x128xf32>
    %525 = arith.addf %522, %524 : vector<8x128xf32>
    %526 = vector.broadcast %69 : f32 to vector<8x128xf32>
    %527 = arith.mulf %223, %526 : vector<8x128xf32>
    %528 = arith.addf %525, %527 : vector<8x128xf32>
    %529 = vector.broadcast %70 : f32 to vector<8x128xf32>
    %530 = arith.mulf %246, %529 : vector<8x128xf32>
    %531 = arith.addf %528, %530 : vector<8x128xf32>
    %532 = vector.broadcast %71 : f32 to vector<8x128xf32>
    %533 = arith.mulf %269, %532 : vector<8x128xf32>
    %534 = arith.addf %531, %533 : vector<8x128xf32>
    %535 = arith.mulf %534, %534 : vector<8x128xf32>
    %536 = arith.mulf %534, %535 : vector<8x128xf32>
    %cst_271 = arith.constant 4.471500e-02 : f32
    %537 = vector.broadcast %cst_271 : f32 to vector<8x128xf32>
    %538 = arith.mulf %537, %536 : vector<8x128xf32>
    %539 = arith.addf %534, %538 : vector<8x128xf32>
    %cst_272 = arith.constant 0.797884583 : f32
    %540 = vector.broadcast %cst_272 : f32 to vector<8x128xf32>
    %541 = arith.mulf %540, %539 : vector<8x128xf32>
    %542 = math.tanh %541 : vector<8x128xf32>
    %cst_273 = arith.constant 1.000000e+00 : f32
    %543 = vector.broadcast %cst_273 : f32 to vector<8x128xf32>
    %544 = arith.addf %543, %542 : vector<8x128xf32>
    %cst_274 = arith.constant 5.000000e-01 : f32
    %545 = vector.broadcast %cst_274 : f32 to vector<8x128xf32>
    %546 = arith.mulf %545, %544 : vector<8x128xf32>
    %547 = arith.mulf %534, %546 : vector<8x128xf32>
    %548 = vector.broadcast %115 : f32 to vector<8x128xf32>
    %549 = arith.mulf %547, %548 : vector<8x128xf32>
    %550 = arith.addf %515, %549 : vector<8x128xf32>
    %551 = vector.broadcast %104 : f32 to vector<8x128xf32>
    %552 = vector.broadcast %72 : f32 to vector<8x128xf32>
    %553 = arith.mulf %154, %552 : vector<8x128xf32>
    %554 = arith.addf %551, %553 : vector<8x128xf32>
    %555 = vector.broadcast %73 : f32 to vector<8x128xf32>
    %556 = arith.mulf %177, %555 : vector<8x128xf32>
    %557 = arith.addf %554, %556 : vector<8x128xf32>
    %558 = vector.broadcast %74 : f32 to vector<8x128xf32>
    %559 = arith.mulf %200, %558 : vector<8x128xf32>
    %560 = arith.addf %557, %559 : vector<8x128xf32>
    %561 = vector.broadcast %75 : f32 to vector<8x128xf32>
    %562 = arith.mulf %223, %561 : vector<8x128xf32>
    %563 = arith.addf %560, %562 : vector<8x128xf32>
    %564 = vector.broadcast %76 : f32 to vector<8x128xf32>
    %565 = arith.mulf %246, %564 : vector<8x128xf32>
    %566 = arith.addf %563, %565 : vector<8x128xf32>
    %567 = vector.broadcast %77 : f32 to vector<8x128xf32>
    %568 = arith.mulf %269, %567 : vector<8x128xf32>
    %569 = arith.addf %566, %568 : vector<8x128xf32>
    %570 = arith.mulf %569, %569 : vector<8x128xf32>
    %571 = arith.mulf %569, %570 : vector<8x128xf32>
    %cst_275 = arith.constant 4.471500e-02 : f32
    %572 = vector.broadcast %cst_275 : f32 to vector<8x128xf32>
    %573 = arith.mulf %572, %571 : vector<8x128xf32>
    %574 = arith.addf %569, %573 : vector<8x128xf32>
    %cst_276 = arith.constant 0.797884583 : f32
    %575 = vector.broadcast %cst_276 : f32 to vector<8x128xf32>
    %576 = arith.mulf %575, %574 : vector<8x128xf32>
    %577 = math.tanh %576 : vector<8x128xf32>
    %cst_277 = arith.constant 1.000000e+00 : f32
    %578 = vector.broadcast %cst_277 : f32 to vector<8x128xf32>
    %579 = arith.addf %578, %577 : vector<8x128xf32>
    %cst_278 = arith.constant 5.000000e-01 : f32
    %580 = vector.broadcast %cst_278 : f32 to vector<8x128xf32>
    %581 = arith.mulf %580, %579 : vector<8x128xf32>
    %582 = arith.mulf %569, %581 : vector<8x128xf32>
    %583 = vector.broadcast %116 : f32 to vector<8x128xf32>
    %584 = arith.mulf %582, %583 : vector<8x128xf32>
    %585 = arith.addf %550, %584 : vector<8x128xf32>
    %586 = vector.broadcast %105 : f32 to vector<8x128xf32>
    %587 = vector.broadcast %78 : f32 to vector<8x128xf32>
    %588 = arith.mulf %154, %587 : vector<8x128xf32>
    %589 = arith.addf %586, %588 : vector<8x128xf32>
    %590 = vector.broadcast %79 : f32 to vector<8x128xf32>
    %591 = arith.mulf %177, %590 : vector<8x128xf32>
    %592 = arith.addf %589, %591 : vector<8x128xf32>
    %593 = vector.broadcast %80 : f32 to vector<8x128xf32>
    %594 = arith.mulf %200, %593 : vector<8x128xf32>
    %595 = arith.addf %592, %594 : vector<8x128xf32>
    %596 = vector.broadcast %81 : f32 to vector<8x128xf32>
    %597 = arith.mulf %223, %596 : vector<8x128xf32>
    %598 = arith.addf %595, %597 : vector<8x128xf32>
    %599 = vector.broadcast %82 : f32 to vector<8x128xf32>
    %600 = arith.mulf %246, %599 : vector<8x128xf32>
    %601 = arith.addf %598, %600 : vector<8x128xf32>
    %602 = vector.broadcast %83 : f32 to vector<8x128xf32>
    %603 = arith.mulf %269, %602 : vector<8x128xf32>
    %604 = arith.addf %601, %603 : vector<8x128xf32>
    %605 = arith.mulf %604, %604 : vector<8x128xf32>
    %606 = arith.mulf %604, %605 : vector<8x128xf32>
    %cst_279 = arith.constant 4.471500e-02 : f32
    %607 = vector.broadcast %cst_279 : f32 to vector<8x128xf32>
    %608 = arith.mulf %607, %606 : vector<8x128xf32>
    %609 = arith.addf %604, %608 : vector<8x128xf32>
    %cst_280 = arith.constant 0.797884583 : f32
    %610 = vector.broadcast %cst_280 : f32 to vector<8x128xf32>
    %611 = arith.mulf %610, %609 : vector<8x128xf32>
    %612 = math.tanh %611 : vector<8x128xf32>
    %cst_281 = arith.constant 1.000000e+00 : f32
    %613 = vector.broadcast %cst_281 : f32 to vector<8x128xf32>
    %614 = arith.addf %613, %612 : vector<8x128xf32>
    %cst_282 = arith.constant 5.000000e-01 : f32
    %615 = vector.broadcast %cst_282 : f32 to vector<8x128xf32>
    %616 = arith.mulf %615, %614 : vector<8x128xf32>
    %617 = arith.mulf %604, %616 : vector<8x128xf32>
    %618 = vector.broadcast %117 : f32 to vector<8x128xf32>
    %619 = arith.mulf %617, %618 : vector<8x128xf32>
    %620 = arith.addf %585, %619 : vector<8x128xf32>
    %621 = vector.broadcast %106 : f32 to vector<8x128xf32>
    %622 = vector.broadcast %84 : f32 to vector<8x128xf32>
    %623 = arith.mulf %154, %622 : vector<8x128xf32>
    %624 = arith.addf %621, %623 : vector<8x128xf32>
    %625 = vector.broadcast %85 : f32 to vector<8x128xf32>
    %626 = arith.mulf %177, %625 : vector<8x128xf32>
    %627 = arith.addf %624, %626 : vector<8x128xf32>
    %628 = vector.broadcast %86 : f32 to vector<8x128xf32>
    %629 = arith.mulf %200, %628 : vector<8x128xf32>
    %630 = arith.addf %627, %629 : vector<8x128xf32>
    %631 = vector.broadcast %87 : f32 to vector<8x128xf32>
    %632 = arith.mulf %223, %631 : vector<8x128xf32>
    %633 = arith.addf %630, %632 : vector<8x128xf32>
    %634 = vector.broadcast %88 : f32 to vector<8x128xf32>
    %635 = arith.mulf %246, %634 : vector<8x128xf32>
    %636 = arith.addf %633, %635 : vector<8x128xf32>
    %637 = vector.broadcast %89 : f32 to vector<8x128xf32>
    %638 = arith.mulf %269, %637 : vector<8x128xf32>
    %639 = arith.addf %636, %638 : vector<8x128xf32>
    %640 = arith.mulf %639, %639 : vector<8x128xf32>
    %641 = arith.mulf %639, %640 : vector<8x128xf32>
    %cst_283 = arith.constant 4.471500e-02 : f32
    %642 = vector.broadcast %cst_283 : f32 to vector<8x128xf32>
    %643 = arith.mulf %642, %641 : vector<8x128xf32>
    %644 = arith.addf %639, %643 : vector<8x128xf32>
    %cst_284 = arith.constant 0.797884583 : f32
    %645 = vector.broadcast %cst_284 : f32 to vector<8x128xf32>
    %646 = arith.mulf %645, %644 : vector<8x128xf32>
    %647 = math.tanh %646 : vector<8x128xf32>
    %cst_285 = arith.constant 1.000000e+00 : f32
    %648 = vector.broadcast %cst_285 : f32 to vector<8x128xf32>
    %649 = arith.addf %648, %647 : vector<8x128xf32>
    %cst_286 = arith.constant 5.000000e-01 : f32
    %650 = vector.broadcast %cst_286 : f32 to vector<8x128xf32>
    %651 = arith.mulf %650, %649 : vector<8x128xf32>
    %652 = arith.mulf %639, %651 : vector<8x128xf32>
    %653 = vector.broadcast %118 : f32 to vector<8x128xf32>
    %654 = arith.mulf %652, %653 : vector<8x128xf32>
    %655 = arith.addf %620, %654 : vector<8x128xf32>
    %656 = vector.broadcast %107 : f32 to vector<8x128xf32>
    %657 = vector.broadcast %90 : f32 to vector<8x128xf32>
    %658 = arith.mulf %154, %657 : vector<8x128xf32>
    %659 = arith.addf %656, %658 : vector<8x128xf32>
    %660 = vector.broadcast %91 : f32 to vector<8x128xf32>
    %661 = arith.mulf %177, %660 : vector<8x128xf32>
    %662 = arith.addf %659, %661 : vector<8x128xf32>
    %663 = vector.broadcast %92 : f32 to vector<8x128xf32>
    %664 = arith.mulf %200, %663 : vector<8x128xf32>
    %665 = arith.addf %662, %664 : vector<8x128xf32>
    %666 = vector.broadcast %93 : f32 to vector<8x128xf32>
    %667 = arith.mulf %223, %666 : vector<8x128xf32>
    %668 = arith.addf %665, %667 : vector<8x128xf32>
    %669 = vector.broadcast %94 : f32 to vector<8x128xf32>
    %670 = arith.mulf %246, %669 : vector<8x128xf32>
    %671 = arith.addf %668, %670 : vector<8x128xf32>
    %672 = vector.broadcast %95 : f32 to vector<8x128xf32>
    %673 = arith.mulf %269, %672 : vector<8x128xf32>
    %674 = arith.addf %671, %673 : vector<8x128xf32>
    %675 = arith.mulf %674, %674 : vector<8x128xf32>
    %676 = arith.mulf %674, %675 : vector<8x128xf32>
    %cst_287 = arith.constant 4.471500e-02 : f32
    %677 = vector.broadcast %cst_287 : f32 to vector<8x128xf32>
    %678 = arith.mulf %677, %676 : vector<8x128xf32>
    %679 = arith.addf %674, %678 : vector<8x128xf32>
    %cst_288 = arith.constant 0.797884583 : f32
    %680 = vector.broadcast %cst_288 : f32 to vector<8x128xf32>
    %681 = arith.mulf %680, %679 : vector<8x128xf32>
    %682 = math.tanh %681 : vector<8x128xf32>
    %cst_289 = arith.constant 1.000000e+00 : f32
    %683 = vector.broadcast %cst_289 : f32 to vector<8x128xf32>
    %684 = arith.addf %683, %682 : vector<8x128xf32>
    %cst_290 = arith.constant 5.000000e-01 : f32
    %685 = vector.broadcast %cst_290 : f32 to vector<8x128xf32>
    %686 = arith.mulf %685, %684 : vector<8x128xf32>
    %687 = arith.mulf %674, %686 : vector<8x128xf32>
    %688 = vector.broadcast %119 : f32 to vector<8x128xf32>
    %689 = arith.mulf %687, %688 : vector<8x128xf32>
    %690 = arith.addf %655, %689 : vector<8x128xf32>
    %691 = arith.mulf %690, %128 : vector<8x128xf32>
    %c0_291 = arith.constant 0 : index
    %c0_292 = arith.constant 0 : index
    %692 = arith.index_cast %122 : i32 to index
    %c0_293 = arith.constant 0 : index
    %693 = vector.load %arg9[%c0_291, %c0_292, %692, %c0_293] : memref<1x1x8x128xf32, #tpu.memory_space<vmem>>, vector<1x1x8x128xf32>
    %694 = vector.shape_cast %693 : vector<1x1x8x128xf32> to vector<8x128xf32>
    %695 = vector.shape_cast %691 : vector<8x128xf32> to vector<1x1x8x128xf32>
    tpu.vector_store %arg9[%c0_291, %c0_292, %692, %c0_293], %695 {strides = array<i32>} : memref<1x1x8x128xf32, #tpu.memory_space<vmem>>, vector<1x1x8x128xf32>,
    %c1_i32 = arith.constant 1 : i32
    return
  }
  func.func @transform_0(%arg0: i32, %arg1: i32) -> (i32, i32, i32, i32) {
    %c0_i32 = arith.constant 0 : i32
    %c0_i32_0 = arith.constant 0 : i32
    %c0_i32_1 = arith.constant 0 : i32
    return %arg0, %c0_i32, %arg1, %c0_i32_0 : i32, i32, i32, i32
  }
  func.func @transform_1(%arg0: i32, %arg1: i32) -> (i32, i32) {
    %c0_i32 = arith.constant 0 : i32
    %c0_i32_0 = arith.constant 0 : i32
    %c0_i32_1 = arith.constant 0 : i32
    return %c0_i32, %c0_i32_0 : i32, i32
  }
  func.func @transform_2(%arg0: i32, %arg1: i32) -> i32 {
    %c0_i32 = arith.constant 0 : i32
    %c0_i32_0 = arith.constant 0 : i32
    return %c0_i32 : i32
  }
  func.func @transform_3(%arg0: i32, %arg1: i32) -> (i32, i32) {
    %c0_i32 = arith.constant 0 : i32
    %c0_i32_0 = arith.constant 0 : i32
    %c0_i32_1 = arith.constant 0 : i32
    return %c0_i32, %c0_i32_0 : i32, i32
  }
  func.func @transform_4(%arg0: i32, %arg1: i32) -> i32 {
    %c0_i32 = arith.constant 0 : i32
    %c0_i32_0 = arith.constant 0 : i32
    return %c0_i32 : i32
  }
  func.func @transform_5(%arg0: i32, %arg1: i32) -> (i32, i32) {
    %c0_i32 = arith.constant 0 : i32
    %c0_i32_0 = arith.constant 0 : i32
    %c0_i32_1 = arith.constant 0 : i32
    return %c0_i32, %c0_i32_0 : i32, i32
  }
  func.func @transform_6(%arg0: i32, %arg1: i32) -> i32 {
    %c0_i32 = arith.constant 0 : i32
    %c0_i32_0 = arith.constant 0 : i32
    return %c0_i32 : i32
  }
  func.func @transform_7(%arg0: i32, %arg1: i32) -> (i32, i32, i32, i32) {
    %c0_i32 = arith.constant 0 : i32
    %c0_i32_0 = arith.constant 0 : i32
    %c0_i32_1 = arith.constant 0 : i32
    return %arg0, %c0_i32, %arg1, %c0_i32_0 : i32, i32, i32, i32
  }
}

</mosaic_0001>

<bundles_post_ra>
// kernel: tpu_custom_call.1
= control target key start
LH: loop header
LB: loop body
LE: loop exit
PB: predicated region body
PF: predicated region fallthrough
CT: control target
= control target key end

     0   :  { %s2585_s0 = inlined_call_operand.hbm [shape: f32[2,3,8,128], index: 0, kind: input, shape index: {}]   ;;  %s2586_s1 = inlined_call_operand.vmem [shape: f32[6,3], index: 1, kind: input, shape index: {}]   ;;  %s2587_s2 = inlined_call_operand.vmem [shape: f32[6], index: 2, kind: input, shape index: {}]   ;;  %s2588_s3 = inlined_call_operand.vmem [shape: f32[12,6], index: 3, kind: input, shape index: {}]   ;;  %s2589_s4 = inlined_call_operand.vmem [shape: f32[12], index: 4, kind: input, shape index: {}]   ;;  %s2590_s5 = inlined_call_operand.vmem [shape: f32[1,12], index: 5, kind: input, shape index: {}]   ;;  %s2591_s6 = inlined_call_operand.<no memory space> [shape: f32[1], index: 6, kind: input, shape index: {}]   ;;  %s2592_s7 = inlined_call_operand.hbm [shape: f32[2,1,8,128], index: 7, kind: output, shape index: {}]  }
   0x1   :  { %2609 = sst [smem:[#allocation35_spill]] %s2585_s0 }
   0x2   :  { %2610 = sst [smem:[#allocation36_spill]] %s2586_s1 }
   0x3   :  { %2611 = sst [smem:[#allocation37_spill]] %s2587_s2 }
   0x4   :  { %2612 = sst [smem:[#allocation38_spill]] %s2588_s3 }
   0x5   :  { %2613 = sst [smem:[#allocation39_spill]] %s2589_s4 }
   0x6   :  { %2614 = sst [smem:[#allocation40_spill]] %s2590_s5 }
   0x7   :  { %2615 = sst [smem:[#allocation41_spill]] %s2592_s7 }
   0x8   :  { %12 = sst [smem:[#allocation2]] %s2591_s6 }
   0x9   :  { %13 = vsyncpa [#allocation4], 0 }
   0xa   :  { %15 = vsyncpa [#allocation4 + $0x1], 0 }
   0xb   :  { %16 = vsyncpa [#allocation6], 0 }
   0xc   :  { %17 = vsyncpa [#allocation9], 0 }
   0xd   :  { %18 = vsyncpa [#allocation12], 0 }
   0xe   :  { %19 = vsyncpa [#allocation5], 0 }
   0xf   :  { %21 = vsyncpa [#allocation5 + $0x1], 0  ;;  %s1694_s26 = smov 0   ;;  %s1696_s27 = smov 0  }
  0x10   :  { %s1698_s28 = smov 0   ;;  %s1700_s29 = smov 0  }
  0x11   :  { %s1702_s30 = smov 0   ;;  %s1704_s8 = smov 0  }
  0x12 LB: > { %2616 = sst [smem:[#allocation20_spill]] %s1622_s26  ;;  %s1150_s11 = sadd.s32 4294967295, %s1642_s8   ;;  %s1642_s8 = sphi %s1704_s8, %s27_s8   ;;  %s1638_s30 = sphi %s1702_s30, %s2662_s30   ;;  %s1634_s29 = sphi %s1700_s29, %s2661_s29   ;;  %s1630_s28 = sphi %s1698_s28, %s2660_s28   ;;  %s1626_s27 = sphi %s1696_s27, %s2659_s27   ;;  %s1622_s26 = sphi %s1694_s26, %s2658_s26  }
  0x13   : > { %2617 = sst [smem:[#allocation21_spill]] %s1626_s27  ;;  %p1152_p0 = scmp.ge.s32.totalorder %s1642_s8, 1 }
  0x14   : > { %2618 = sst [smem:[#allocation22_spill]] %s1630_s28  ;;  %p1731_p1 = scmp.eq.s32.totalorder %s1150_s11, 0 }
  0x15   : > { %2619 = sst [smem:[#allocation23_spill]] %s1634_s29  ;;  %p226_p2 = scmp.lt.s32.totalorder %s1642_s8, 3 }
  0x16   : > { %2620 = sst [smem:[#allocation24_spill]] %s1638_s30  ;;  %p1158_p4 = scmp.ge.s32.totalorder %s1642_s8, 2 }
  0x17   : > { %2621 = sst [smem:[#allocation25_spill]] %s1642_s8  ;;  %p1736_p3 = pnand %p1152_p0, %p226_p2 }
  0x18   : > { %s2622_s2 = sld [smem:[#allocation37_spill]]  ;;  %s1644_s24 = smov [#allocation8]  }
  0x19   : > { %s2625_s4 = sld [smem:[#allocation39_spill]]  ;;  %p1315_p5 = pneg %p1736_p3 }
  0x1a   : > { %s2626_s1 = sld [smem:[#allocation36_spill]]  ;;  %s1645_s25 = smov [#allocation11]  }
  0x1b   : > { %p1751_p6 = pnand %p1315_p5, %p1731_p1  ;;  %s2628_s3 = sld [smem:[#allocation38_spill]] }
  0x1c   : > { %s1646_s6 = smov [#allocation7]   ;;  %s1647_s9 = smov [#allocation10]  }
  0x1d   : > { %s2593_s14 = smov 128   ;;  %s2594_s15 = smov 8  }
  0x1e   : > { %s248_s10 = sshll.u32 %s2622_s2, 4  ;;  %s2629_s5 = sld [smem:[#allocation40_spill]]  ;;  %s249_s10 = int_to_ptr.vmem [resolvable:$true] %s248_s10 }
  0x1f   : > { %s270_s16 = sshll.u32 %s2625_s4, 4  ;;  %s1650_s18 = smov [#allocation13]   ;;  %s271_s16 = int_to_ptr.vmem [resolvable:$true] %s270_s16 }
  0x20   : > { %s238_s19 = sshll.u32 %s2626_s1, 4  ;;  %s39_s21 = sadd.s32 1, %s1638_s30  ;;  %s239_s19 = int_to_ptr.vmem [resolvable:$true] %s238_s19 }
  0x21   : > { %s257_s23 = sshll.u32 %s2628_s3, 4  ;;  %s48_s22 = sadd.s32 1, %s1630_s28  ;;  %s258_s23 = int_to_ptr.vmem [resolvable:$true] %s257_s23 }
  0x22   : > { %1321 = dma.vmem_to_smem (!%p1751_p6), %s249_s10, 16, %s1644_s24, [#allocation9]  }
  0x23   : > { %1327 = dma.vmem_to_smem (!%p1751_p6), %s271_s16, 16, %s1645_s25, [#allocation12]  }
  0x24   : > { %1318 = dma.vmem_to_smem (!%p1751_p6), %s239_s19, 128, %s1646_s6, [#allocation6]  }
  0x25   : > { %1324 = dma.vmem_to_smem (!%p1751_p6), %s258_s23, 256, %s1647_s9, [#allocation9], %s2593_s14, %s2593_s14, %s2594_s15  }
  0x26   : > { %s280_s17 = sshll.u32 %s2629_s5, 4  ;;  %s1151_s19 = sadd.s32 4294967294, %s1642_s8   ;;  %s281_s17 = int_to_ptr.vmem [resolvable:$true] %s280_s17 }
  0x27   : > { %1330 = dma.vmem_to_smem (!%p1751_p6), %s281_s17, 16, %s1650_s18, [#allocation12]  }
  0x28   : > { %p41_p7 = scmp.ge.s32.totalorder %s39_s21, 2  ;;  %p55_p8 = scmp.ne.s32.totalorder %s1630_s28, %s1626_s27 }
  0x29   : > { %p56_p9 = scmp.eq.s32.totalorder %s1642_s8, 0  ;;  %p61_p10 = scmp.ne.s32.totalorder %s1626_s27, %s1622_s26 }
  0x2a   : > { %s2664_s21 = smov (%p41_p7, %s39_s21), 0  ;;  %p213_p13 = scmp.eq.s32.totalorder %s1150_s11, 1 }
  0x2b   : > { %2630 = sst [smem:[#allocation26_spill]] %s2664_s21  ;;  %p1784_p11 = por %p56_p9, %p55_p8 }
  0x2c   : > { %p1790_p12 = por %p1731_p1, %p61_p10  ;;  %s43_s24 = ssub.s32 %s1638_s30, %s2664_s21 }
  0x2d   : > { %p46_p0 = scmp.eq.s32.totalorder %s43_s24, 0  ;;  %p219_p2 = scmp.eq.s32.totalorder %s1151_s19, 1 }
  0x2e   : > { %p1798_p5 = por %p213_p13, %p55_p8  ;;  %p1344_p6 = scmp.lt.s32.totalorder %s1642_s8, 2 }
  0x2f   : > { %s1804_s6 = scalar_select %p46_p0, %s1630_s28, %s48_s22  }
  0x30   : > { %s2633_s25 = scalar_select %p1798_p5, 1, 0 }
  0x31   : > { %2635 = sst [smem:[#allocation28_spill]] %s1804_s6  ;;  %p1806_p7 = por %p219_p2, %p61_p10 }
  0x32   : > { %2634 = sst [smem:[#allocation27_spill]] %s2633_s25  ;;  %s294_s10 = sand.u32 1, %s1630_s28  }
  0x33   : > { %s2636_s9 = scalar_select %p1806_p7, 1, 0 }
  0x34   : > { %s1288_s16 = smul.u32 24, %s294_s10  ;;  %p1332_p9 = pnand %p1344_p6, %p1784_p11 }
  0x35   : > { %2637 = sst [smem:[#allocation29_spill]] %s2636_s9  ;;  %s1289_s17 = smul.u32 24, %s1638_s30 }
  0x36   : > { %s2638_s0 = sld [smem:[#allocation35_spill]]  ;;  %s298_s24 = scalar_lea.vmem [#allocation3], %s1288_s16 }
  0x37   : > { %s307_s14 = sshll.u32 %s298_s24, 4  ;;  %s295_s22 = scalar_lea.sflag [#allocation4], %s294_s10  ;;  %s308_s14 = int_to_ptr.vmem [resolvable:$true] %s307_s14 }
  0x38   : > { %s2639_s1 = smov 8   ;;  %s2640_s2 = smov 128  }
  0x3a   : > { %319 = sbr.rel (%p1736_p3) target bundleno = 260 (0x104), region = 48 }
  0x3c   : > { %s304_s19 = scalar_lea.hbm %s2638_s0, %s1289_s17 }
  0x3d   : > { %s305_s15 = sshll.u32 %s304_s19, 4  ;;  %s306_s15 = int_to_ptr.hbm [resolvable:$true] %s305_s15 }
  0x3e   : > { %1334 = dma.hbm_to_vmem [thread:$0]  (!%p1332_p9), %s306_s15, 384, %s308_s14, %s295_s22, %s2640_s2, %s2640_s2, %s2639_s1  }
  0x3f   : > { %s1823_s23 = sand.u32 1, %s1626_s27  }
  0x40   : > { %2641 = sst [smem:[#allocation30_spill]] %s1823_s23  ;;  %s1290_s17 = smul.u32 24, %s1823_s23 }
  0x41   : > { %s322_s16 = scalar_lea.sflag [#allocation4], %s1823_s23 }
  0x42   : > { %s1827_s18 = scalar_lea.vmem [#allocation3], %s1290_s17 }
  0x43   : > { %2642 = sst [smem:[#allocation31_spill]] %s1827_s18 }
  0x44   : > { %1601 = dma.done.wait (%p1790_p12), %s322_s16, 384  }
  0x45   : > { %1603 = vsyncadd (%p1790_p12), %s322_s16, 4294966912 }
  0x46   : > { %1605 = dma.done.wait (%p1731_p1), [#allocation6], 128  }
  0x47   : > { %1607 = vsyncadd (%p1731_p1), [#allocation6], 4294967168 }
  0x48   : > { %1609 = dma.done.wait (%p1731_p1), [#allocation9], 272  }
  0x49   : > { %1611 = vsyncadd (%p1731_p1), [#allocation9], 4294967024 }
  0x4a   : > { %1613 = dma.done.wait (%p1731_p1), [#allocation12], 32  }
  0x4b   : > { %1615 = vsyncadd (%p1731_p1), [#allocation12], 4294967264 }
  0x4c   : > { %356 = sfence }
  0x4d   : > { %s383_s1 = sld [smem:[#allocation7]]  ;;  %v1866_v0 = vld [vmem:[%s1827_s18] sm:$0xff]  ;;  %v1874_v3 = vld [vmem:[%s1827_s18 + $0x8] sm:$0xff]  ;;  %v1883_v10 = vld [vmem:[%s1827_s18 + $0x10] sm:$0xff] }
  0x4e   : > { %s1167_s2 = sld [smem:[#allocation7 + $0x1]] }
  0x4f   : > { %s1845_s13 = sld [smem:[#allocation7 + $0x2]] }
  0x50   : > { %s1169_s14 = sld [smem:[#allocation7 + $0x80]] }
  0x51   : > { %s1847_s15 = sld [smem:[#allocation7 + $0x81]] }
  0x52   : > { %s1849_s20 = sld [smem:[#allocation7 + $0x82]] }
  0x53   : > { %s1851_s10 = sld [smem:[#allocation7 + $0x100]]  ;;  %v512_v1 = vstv %s383_s1 }
  0x54   : > { %s1853_s11 = sld [smem:[#allocation7 + $0x101]]  ;;  %v513_v2 = vmul.f32 %v512_v1, %v1866_v0  ;;  %v515_v5 = vstv %s1167_s2 }
  0x55   : > { %s401_s19 = sld [smem:[#allocation8]]  ;;  %v516_v8 = vmul.f32 %v1874_v3, %v515_v5  ;;  %v518_v11 = vstv %s1845_s13 }
  0x56   : > { %s1855_s24 = sld [smem:[#allocation7 + $0x102]]  ;;  %v531_v6 = vstv %s1169_s14  ;;  %v519_v15 = vmul.f32 %v1883_v10, %v518_v11 }
  0x57   : > { %s1184_s12 = sld [smem:[#allocation8 + $0x1]]  ;;  %v532_v9 = vmul.f32 %v531_v6, %v1866_v0  ;;  %v534_v13 = vstv %s1847_s15 }
  0x58   : > { %s1857_s22 = sld [smem:[#allocation7 + $0x180]]  ;;  %v535_v17 = vmul.f32 %v1874_v3, %v534_v13  ;;  %v537_v18 = vstv %s1849_s20 }
  0x59   : > { %s1859_s17 = sld [smem:[#allocation8 + $0x2]]  ;;  %v550_v20 = vstv %s1851_s10  ;;  %v538_v24 = vmul.f32 %v1883_v10, %v537_v18 }
  0x5a   : > { %s1861_s16 = sld [smem:[#allocation7 + $0x181]]  ;;  %v553_v21 = vstv %s1853_s11  ;;  %v551_v25 = vmul.f32 %v550_v20, %v1866_v0 }
  0x5b   : > { %s1863_s0 = sld [smem:[#allocation8 + $0x3]]  ;;  %v511_v4 = vstv %s401_s19  ;;  %v554_v26 = vmul.f32 %v1874_v3, %v553_v21 }
  0x5c   : > { %s1868_s3 = sld [smem:[#allocation7 + $0x182]]  ;;  %v514_v7 = vadd.f32 %v513_v2, %v511_v4  ;;  %v556_v27 = vstv %s1855_s24 }
  0x5d   : > { %s1871_s4 = sld [smem:[#allocation8 + $0x4]]  ;;  %v530_v12 = vstv %s1184_s12  ;;  %v557_v33 = vmul.f32 %v1883_v10, %v556_v27 }
  0x5e   : > { %s1876_s5 = sld [smem:[#allocation7 + $0x200]]  ;;  %v517_v14 = vadd.f32 %v516_v8, %v514_v7  ;;  %v533_v16 = vadd.f32 %v532_v9, %v530_v12  ;;  %v569_v29 = vstv %s1857_s22 }
  0x5f   : > { %s1880_s1 = sld [smem:[#allocation7 + $0x201]]  ;;  %v549_v19 = vstv %s1859_s17  ;;  %v570_v34 = vmul.f32 %v569_v29, %v1866_v0 }
  0x60   : > { %s1887_s2 = sld [smem:[#allocation7 + $0x202]]  ;;  %v1899_v22 = vadd.f32 %v519_v15, %v517_v14  ;;  %v536_v23 = vadd.f32 %v535_v17, %v533_v16  ;;  %v552_v32 = vadd.f32 %v551_v25, %v549_v19  ;;  %v572_v35 = vstv %s1861_s16 }
  0x61   : > { %s1891_s14 = sld [smem:[#allocation8 + $0x5]]  ;;  %v568_v28 = vstv %s1863_s0  ;;  %v573_v41 = vmul.f32 %v1874_v3, %v572_v35 }
  0x62   : > { %s1897_s13 = sld [smem:[#allocation7 + $0x280]]  ;;  %v521_v30 = vmul.f32 %v1899_v22, %v1899_v22  ;;  %v1913_v31 = vadd.f32 %v538_v24, %v536_v23  ;;  %v575_v36 = vstv %s1868_s3  ;;  %v555_v40 = vadd.f32 %v554_v26, %v552_v32 }
  0x63   : > { %s1903_s15 = sld [smem:[#allocation7 + $0x281]]  ;;  %v587_v37 = vstv %s1871_s4  ;;  %v571_v42 = vadd.f32 %v570_v34, %v568_v28  ;;  %v576_v43 = vmul.f32 %v1883_v10, %v575_v36 }
  0x64   : > { %s1909_s20 = sld [smem:[#allocation7 + $0x282]]  ;;  %v522_v38 = vmul.f32 %v521_v30, %v1899_v22  ;;  %v540_v39 = vmul.f32 %v1913_v31, %v1913_v31  ;;  %v588_v44 = vstv %s1876_s5  ;;  %v1936_v48 = vadd.f32 %v557_v33, %v555_v40 }
  0x65   : > { %s1916_s10 = sld [smem:[#allocation10]]  ;;  %v591_v45 = vstv %s1880_s1  ;;  %v589_v49 = vmul.f32 %v588_v44, %v1866_v0  ;;  %v574_v50 = vadd.f32 %v573_v41, %v571_v42 }
  0x66   : > { %s1922_s0 = sld [smem:[#allocation10 + $0x1]]  ;;  %v523_v46 = vmul.f32 0.044715, %v522_v38  ;;  %v541_v47 = vmul.f32 %v540_v39, %v1913_v31  ;;  %v592_v51 = vmul.f32 %v1874_v3, %v591_v45  ;;  %v594_v52 = vstv %s1887_s2 }
  0x67   : > { %s1928_s11 = sld [smem:[#allocation10 + $0x2]]  ;;  %v606_v53 = vstv %s1891_s14  ;;  %v559_v56 = vmul.f32 %v1936_v48, %v1936_v48  ;;  %v590_v57 = vadd.f32 %v589_v49, %v587_v37  ;;  %v1951_v58 = vadd.f32 %v576_v43, %v574_v50 }
  0x68   : > { %s1933_s3 = sld [smem:[#allocation10 + $0x3]]  ;;  %v524_v54 = vadd.f32 %v523_v46, %v1899_v22  ;;  %v542_v55 = vmul.f32 0.044715, %v541_v47  ;;  %v595_v59 = vmul.f32 %v1883_v10, %v594_v52  ;;  %v607_v60 = vstv %s1897_s13 }
  0x69   : > { %s1939_s4 = sld [smem:[#allocation10 + $0x4]]  ;;  %v610_v61 = vstv %s1903_s15  ;;  %v560_v1 = vmul.f32 %v559_v56, %v1936_v48  ;;  %v593_v2 = vadd.f32 %v592_v51, %v590_v57  ;;  %v578_v4 = vmul.f32 %v1951_v58, %v1951_v58 }
  0x6a   : > { %s1944_s5 = sld [smem:[#allocation10 + $0x5]]  ;;  %v525_v62 = vmul.f32 0.7978846, %v524_v54  ;;  %v543_v63 = vadd.f32 %v542_v55, %v1913_v31  ;;  %v608_v5 = vmul.f32 %v607_v60, %v1866_v0  ;;  %v611_v6 = vmul.f32 %v1874_v3, %v610_v61 }
  0x6b   : > { %s1949_s19 = sld [smem:[#allocation10 + $0x80]]  ;;  %v613_v7 = vstv %s1909_s20  ;;  %v561_v9 = vmul.f32 0.044715, %v560_v1  ;;  %v1969_v11 = vadd.f32 %v595_v59, %v593_v2  ;;  %v579_v12 = vmul.f32 %v578_v4, %v1951_v58 }
  0x6c   : > { %s1956_s24 = sld [smem:[#allocation10 + $0x81]]  ;;  %v544_v8 = vmul.f32 0.7978846, %v543_v63  ;;  %v609_v13 = vadd.f32 %v608_v5, %v606_v53  ;;  %v614_v14 = vmul.f32 %v1883_v10, %v613_v7  ;;  %1406 = vtanh.f32 %v525_v62 }
  0x6d   : > { %s1960_s12 = sld [smem:[#allocation10 + $0x82]]  ;;  %v562_v0 = vadd.f32 %v561_v9, %v1936_v48  ;;  %v597_v3 = vmul.f32 %v1969_v11, %v1969_v11  ;;  %v580_v15 = vmul.f32 0.044715, %v579_v12  ;;  %v627_v45 = vstv %s1916_s10 }
  0x6e   : > { %s1967_s22 = sld [smem:[#allocation10 + $0x83]]  ;;  %1408 = vtanh.f32 %v544_v8  ;;  %v612_v16 = vadd.f32 %v611_v6, %v609_v13  ;;  %v630_v46 = vstv %s1922_s0  ;;  %v633_v56 = vstv %s1928_s11 }
  0x6f   : > { %s1971_s17 = sld [smem:[#allocation10 + $0x84]]  ;;  %v563_v17 = vmul.f32 0.7978846, %v562_v0  ;;  %v598_v18 = vmul.f32 %v597_v3, %v1969_v11  ;;  %v581_v10 = vadd.f32 %v580_v15, %v1951_v58  ;;  %v636_v63 = vstv %s1933_s3 }
  0x70   : > { %s1975_s16 = sld [smem:[#allocation10 + $0x85]]  ;;  %v1988_v19 = vadd.f32 %v614_v14, %v612_v16  ;;  %v639_v9 = vstv %s1939_s4  ;;  %v642_v3 = vstv %s1944_s5 }
  0x71   : > { %s1980_s1 = sld [smem:[#allocation10 + $0x100]]  ;;  %v599_v20 = vmul.f32 0.044715, %v598_v18  ;;  %1410 = vtanh.f32 %v563_v17  ;;  %v582_v21 = vmul.f32 0.7978846, %v581_v10 }
  0x72   : > { %s1982_s2 = sld [smem:[#allocation10 + $0x101]]  ;;  %v616_v23 = vmul.f32 %v1988_v19, %v1988_v19  ;;  %v1407_v24 = vpop.eup %1406  ;;  %v661_v53 = vstv %s1956_s24 }
  0x73   : > { %s1985_s14 = sld [smem:[#allocation10 + $0x102]]  ;;  %v600_v25 = vadd.f32 %v599_v20, %v1969_v11  ;;  %1412 = vtanh.f32 %v582_v21  ;;  %v527_v29 = vadd.f32 1.0, %v1407_v24  ;;  %v664_v57 = vstv %s1960_s12 }
  0x74   : > { %s1990_s13 = sld [smem:[#allocation10 + $0x103]]  ;;  %v1409_v26 = vpop.eup %1408  ;;  %v617_v27 = vmul.f32 %v616_v23, %v1988_v19  ;;  %v667_v2 = vstv %s1967_s22 }
  0x75   : > { %s1992_s15 = sld [smem:[#allocation10 + $0x104]]  ;;  %v601_v28 = vmul.f32 0.7978846, %v600_v25  ;;  %v546_v32 = vadd.f32 1.0, %v1409_v26  ;;  %v528_v36 = vmul.f32 0.5, %v527_v29  ;;  %v670_v16 = vstv %s1971_s17 }
  0x76   : > { %s1996_s20 = sld [smem:[#allocation10 + $0x105]]  ;;  %v618_v30 = vmul.f32 0.044715, %v617_v27  ;;  %v673_v25 = vstv %s1975_s16 }
  0x77   : > { %s1999_s21 = sld [smem:[#allocation10 + $0x180]]  ;;  %v1411_v33 = vpop.eup %1410  ;;  %1414 = vtanh.f32 %v601_v28  ;;  %v547_v38 = vmul.f32 0.5, %v546_v32  ;;  %v2024_v42 = vmul.f32 %v528_v36, %v1899_v22  ;;  %v689_v54 = vstv %s1980_s1 }
  0x78   : > { %s2002_s30 = sld [smem:[#allocation10 + $0x181]]  ;;  %v619_v34 = vadd.f32 %v618_v30, %v1988_v19  ;;  %v565_v39 = vadd.f32 1.0, %v1411_v33  ;;  %v692_v59 = vstv %s1982_s2 }
  0x79   : > { %s2004_s6 = sld [smem:[#allocation10 + $0x182]]  ;;  %v1413_v35 = vpop.eup %1412  ;;  %v2029_v43 = vmul.f32 %v547_v38, %v1913_v31  ;;  %v2040_v50 = vmul.f32 %v627_v45, %v2024_v42  ;;  %v658_v31 = vstv %s1949_s19  ;;  %v695_v62 = vstv %s1985_s14 }
  0x7a   : > { %s2006_s28 = sld [smem:[#allocation10 + $0x183]]  ;;  %v620_v37 = vmul.f32 0.7978846, %v619_v34  ;;  %v584_v40 = vadd.f32 1.0, %v1413_v35  ;;  %v566_v44 = vmul.f32 0.5, %v565_v39  ;;  %v2064_v61 = vmul.f32 %v658_v31, %v2024_v42 }
  0x7b   : > { %s2008_s27 = sld [smem:[#allocation10 + $0x184]]  ;;  %v2049_v52 = vmul.f32 %v630_v46, %v2029_v43  ;;  %v2071_v1 = vmul.f32 %v661_v53, %v2029_v43  ;;  %v2075_v4 = vmul.f32 %v689_v54, %v2024_v42  ;;  %v2086_v6 = vmul.f32 %v692_v59, %v2029_v43 }
  0x7c   : > { %s2011_s8 = sld [smem:[#allocation10 + $0x185]]  ;;  %1416 = vtanh.f32 %v620_v37  ;;  %v585_v47 = vmul.f32 0.5, %v584_v40  ;;  %v2046_v51 = vmul.f32 %v566_v44, %v1936_v48  ;;  %v698_v17 = vstv %s1990_s13 }
  0x7d   : > { %s2013_s9 = sld [smem:[#allocation10 + $0x200]]  ;;  %v1415_v41 = vpop.eup %1414  ;;  %v720_v7 = vstv %s1999_s21  ;;  %v701_v18 = vstv %s1992_s15  ;;  %v704_v32 = vstv %s1996_s20 }
  0x7e   : > { %s2015_s26 = sld [smem:[#allocation10 + $0x201]]  ;;  %v603_v22 = vadd.f32 1.0, %v1415_v41  ;;  %v2061_v60 = vmul.f32 %v585_v47, %v1951_v58  ;;  %v2080_v58 = vmul.f32 %v633_v56, %v2046_v51  ;;  %v2083_v5 = vmul.f32 %v664_v57, %v2046_v51 }
  0x7f   : > { %s2017_s25 = sld [smem:[#allocation10 + $0x202]]  ;;  %v2093_v12 = vmul.f32 %v695_v62, %v2046_v51  ;;  %v723_v13 = vstv %s2002_s30  ;;  %v2114_v10 = vmul.f32 %v720_v7, %v2024_v42  ;;  %v726_v20 = vstv %s2004_s6 }
  0x80   : > { %s2019_s7 = sld [smem:[#allocation10 + $0x203]]  ;;  %v604_v48 = vmul.f32 0.5, %v603_v22  ;;  %v2102_v0 = vmul.f32 %v636_v63, %v2061_v60  ;;  %v2106_v15 = vmul.f32 %v667_v2, %v2061_v60  ;;  %v729_v21 = vstv %s2006_s28 }
  0x81   : > { %s2021_s18 = sld [smem:[#allocation10 + $0x204]]  ;;  %v732_v23 = vstv %s2008_s27  ;;  %v2141_v30 = vmul.f32 %v698_v17, %v2061_v60  ;;  %v2150_v33 = vmul.f32 %v726_v20, %v2046_v51  ;;  %v2153_v34 = vmul.f32 %v729_v21, %v2061_v60 }
  0x82   : > { %s2026_s29 = sld [smem:[#allocation10 + $0x205]]  ;;  %v1417_v49 = vpop.eup %1416  ;;  %v2099_v14 = vmul.f32 %v604_v48, %v1969_v11  ;;  %v2119_v11 = vmul.f32 %v723_v13, %v2029_v43  ;;  %v735_v36 = vstv %s2011_s8 }
  0x83   : > { %s2032_s23 = sld [smem:[#allocation10 + $0x280]]  ;;  %v622_v55 = vadd.f32 1.0, %v1417_v49  ;;  %v751_v26 = vstv %s2013_s9 }
  0x84   : > { %s2053_s10 = sld [smem:[#allocation10 + $0x284]]  ;;  %v754_v27 = vstv %s2015_s26  ;;  %v2135_v28 = vmul.f32 %v639_v9, %v2099_v14  ;;  %v2138_v29 = vmul.f32 %v670_v16, %v2099_v14  ;;  %v2156_v35 = vmul.f32 %v732_v23, %v2099_v14 }
  0x85   : > { %s2058_s0 = sld [smem:[#allocation10 + $0x285]]  ;;  %v623_v8 = vmul.f32 0.5, %v622_v55  ;;  %v2162_v37 = vmul.f32 %v751_v26, %v2024_v42  ;;  %v2165_v38 = vmul.f32 %v754_v27, %v2029_v43  ;;  %v757_v39 = vstv %s2017_s25 }
  0x86   : > { %2643 = sst [smem:[#allocation32_spill]] %s2019_s7  ;;  %v2192_v53 = vmul.f32 %v757_v39, %v2046_v51 }
  0x87   : > { %2644 = sst [smem:[#allocation33_spill]] %s2021_s18  ;;  %v2127_v24 = vmul.f32 %v623_v8, %v1988_v19  ;;  %v2144_v19 = vmul.f32 %v701_v18, %v2099_v14 }
  0x88   : > { %2645 = sst [smem:[#allocation34_spill]] %s2026_s29 }
  0x89   : > { %s2035_s7 = sld [smem:[#allocation10 + $0x281]]  ;;  %v2171_v40 = vmul.f32 %v642_v3, %v2127_v24  ;;  %v2179_v46 = vmul.f32 %v673_v25, %v2127_v24  ;;  %v2182_v47 = vmul.f32 %v704_v32, %v2127_v24  ;;  %v782_v22 = vstv %s2032_s23 }
  0x8a   : > { %s2037_s18 = sld [smem:[#allocation10 + $0x282]]  ;;  %v2189_v31 = vmul.f32 %v735_v36, %v2127_v24  ;;  %v794_v48 = vstv %s2053_s10  ;;  %v783_v62 = vmul.f32 %v782_v22, %v2024_v42 }
  0x8b   : > { %s2043_s29 = sld [smem:[#allocation10 + $0x283]]  ;;  %v797_v2 = vstv %s2058_s0  ;;  %v2227_v16 = vmul.f32 %v794_v48, %v2099_v14 }
  0x8c   : > { %s2067_s19 = sld [smem:[#allocation10 + $0x300]]  ;;  %v2235_v21 = vmul.f32 %v797_v2, %v2127_v24 }
  0x8d   : > { %s2077_s11 = sld [smem:[#allocation10 + $0x301]] }
  0x8e   : > { %s2089_s3 = sld [smem:[#allocation10 + $0x302]] }
  0x8f   : > { %s2096_s24 = sld [smem:[#allocation10 + $0x303]]  ;;  %v785_v49 = vstv %s2035_s7 }
  0x90   : > { %s2108_s21 = sld [smem:[#allocation10 + $0x304]]  ;;  %v788_v54 = vstv %s2037_s18  ;;  %v786_v63 = vmul.f32 %v785_v49, %v2029_v43 }
  0x91   : > { %s2116_s30 = sld [smem:[#allocation10 + $0x305]]  ;;  %v791_v55 = vstv %s2043_s29  ;;  %v2217_v8 = vmul.f32 %v788_v54, %v2046_v51 }
  0x92   : > { %s2124_s4 = sld [smem:[#allocation10 + $0x380]]  ;;  %v813_v7 = vstv %s2067_s19  ;;  %v2220_v9 = vmul.f32 %v791_v55, %v2061_v60 }
  0x93   : > { %s2132_s5 = sld [smem:[#allocation10 + $0x381]]  ;;  %v816_v13 = vstv %s2077_s11  ;;  %v814_v23 = vmul.f32 %v813_v7, %v2024_v42 }
  0x94   : > { %s2646_s12 = sld [smem:[#allocation32_spill]]  ;;  %v819_v3 = vstv %s2089_s3  ;;  %v817_v27 = vmul.f32 %v816_v13, %v2029_v43 }
  0x95   : > { %s2647_s27 = sld [smem:[#allocation33_spill]]  ;;  %v822_v17 = vstv %s2096_s24  ;;  %v2244_v32 = vmul.f32 %v819_v3, %v2046_v51 }
  0x96   : > { %s2648_s28 = sld [smem:[#allocation34_spill]]  ;;  %v825_v18 = vstv %s2108_s21 }
  0x97   : > { %s2146_s6 = sld [smem:[#allocation10 + $0x382]]  ;;  %v828_v20 = vstv %s2116_s30 }
  0x98   : > { %s2158_s26 = sld [smem:[#allocation10 + $0x383]]  ;;  %v844_v25 = vstv %s2124_s4  ;;  %v2258_v22 = vmul.f32 %v828_v20, %v2127_v24 }
  0x99   : > { %s2168_s9 = sld [smem:[#allocation10 + $0x384]]  ;;  %v847_v26 = vstv %s2132_s5  ;;  %v2263_v55 = vmul.f32 %v844_v25, %v2024_v42 }
  0x9a   : > { %v760_v41 = vstv %s2646_s12  ;;  %s2176_s22 = sld [smem:[#allocation10 + $0x385]]  ;;  %v2266_v48 = vmul.f32 %v847_v26, %v2029_v43 }
  0x9b   : > { %v763_v44 = vstv %s2647_s27  ;;  %s2186_s8 = sld [smem:[#allocation10 + $0x400]]  ;;  %v2199_v56 = vmul.f32 %v760_v41, %v2061_v60 }
  0x9c   : > { %v766_v45 = vstv %s2648_s28  ;;  %s2196_s25 = sld [smem:[#allocation11]]  ;;  %v2202_v57 = vmul.f32 %v763_v44, %v2099_v14  ;;  %v2252_v44 = vmul.f32 %v822_v17, %v2061_v60 }
  0x9d   : > { %v2205_v59 = vmul.f32 %v766_v45, %v2127_v24  ;;  %s2208_s7 = sld [smem:[#allocation11 + $0x1]]  ;;  %v850_v36 = vstv %s2146_s6  ;;  %v2255_v45 = vmul.f32 %v825_v18, %v2099_v14 }
  0x9e   : > { %s2214_s29 = sld [smem:[#allocation11 + $0x2]]  ;;  %v853_v39 = vstv %s2158_s26  ;;  %v2271_v13 = vmul.f32 %v850_v36, %v2046_v51 }
  0x9f   : > { %s2224_s23 = sld [smem:[#allocation11 + $0x3]]  ;;  %v2274_v3 = vmul.f32 %v853_v39, %v2061_v60  ;;  %v856_v20 = vstv %s2168_s9 }
  0xa0   : > { %s2232_s18 = sld [smem:[#allocation11 + $0x4]] }
  0xa1   : > { %s2240_s17 = sld [smem:[#allocation11 + $0x5]] }
  0xa2   : > { %s2248_s16 = sld [smem:[#allocation11 + $0x6]]  ;;  %v626_v41 = vstv %s2196_s25 }
  0xa3   : > { %v629_v49 = vadd.f32 %v2040_v50, %v626_v41  ;;  %v657_v54 = vstv %s2208_s7  ;;  %v859_v41 = vstv %s2176_s22  ;;  %s2284_s1 = sld [smem:[#allocation11 + $0x7]] }
  0xa4   : > { %v660_v2 = vadd.f32 %v2064_v61, %v657_v54  ;;  %v688_v7 = vstv %s2214_s29  ;;  %s2293_s2 = sld [smem:[#allocation10 + $0x401]] }
  0xa5   : > { %v632_v17 = vadd.f32 %v2049_v52, %v629_v49  ;;  %v691_v50 = vadd.f32 %v2075_v4, %v688_v7  ;;  %v719_v18 = vstv %s2224_s23  ;;  %s2298_s14 = sld [smem:[#allocation10 + $0x402]] }
  0xa6   : > { %v663_v25 = vadd.f32 %v2071_v1, %v660_v2  ;;  %v722_v26 = vadd.f32 %v2114_v10, %v719_v18  ;;  %v750_v61 = vstv %s2232_s18  ;;  %s2312_s13 = sld [smem:[#allocation10 + $0x480]] }
  0xa7   : > { %v635_v36 = vadd.f32 %v2080_v58, %v632_v17  ;;  %v694_v39 = vadd.f32 %v2086_v6, %v691_v50  ;;  %v753_v52 = vadd.f32 %v2162_v37, %v750_v61  ;;  %v781_v49 = vstv %s2240_s17  ;;  %s2358_s15 = sld [smem:[#allocation10 + $0x403]] }
  0xa8   : > { %v666_v4 = vadd.f32 %v2083_v5, %v663_v25  ;;  %v725_v54 = vadd.f32 %v2119_v11, %v722_v26  ;;  %v784_v7 = vadd.f32 %v783_v62, %v781_v49  ;;  %v812_v1 = vstv %s2248_s16  ;;  %s2364_s20 = sld [smem:[#allocation11 + $0x8]] }
  0xa9   : > { %v638_v10 = vadd.f32 %v2102_v0, %v635_v36  ;;  %v697_v2 = vadd.f32 %v2093_v12, %v694_v39  ;;  %v756_v58 = vadd.f32 %v2165_v38, %v753_v52  ;;  %v815_v17 = vadd.f32 %v814_v23, %v812_v1  ;;  %s2370_s10 = sld [smem:[#allocation10 + $0x481]] }
  0xaa   : > { %v669_v6 = vadd.f32 %v2106_v15, %v666_v4  ;;  %v728_v37 = vadd.f32 %v2150_v33, %v725_v54  ;;  %v787_v5 = vadd.f32 %v786_v63, %v784_v7  ;;  %v875_v50 = vstv %s2186_s8  ;;  %s2375_s0 = sld [smem:[#allocation11 + $0x9]] }
  0xab   : > { %v641_v11 = vadd.f32 %v2135_v28, %v638_v10  ;;  %v700_v62 = vadd.f32 %v2141_v30, %v697_v2  ;;  %v759_v18 = vadd.f32 %v2192_v53, %v756_v58  ;;  %v2307_v0 = vmul.f32 %v856_v20, %v2099_v14  ;;  %s2380_s19 = sld [smem:[#allocation10 + $0x404]] }
  0xac   : > { %v672_v12 = vadd.f32 %v2138_v29, %v669_v6  ;;  %v731_v38 = vadd.f32 %v2153_v34, %v728_v37  ;;  %v790_v15 = vadd.f32 %v2217_v8, %v787_v5  ;;  %v818_v23 = vadd.f32 %v817_v27, %v815_v17  ;;  %s2384_s11 = sld [smem:[#allocation10 + $0x482]] }
  0xad   : > { %v2315_v33 = vadd.f32 %v2171_v40, %v641_v11  ;;  %v703_v28 = vadd.f32 %v2144_v19, %v700_v62  ;;  %v762_v30 = vadd.f32 %v2199_v56, %v759_v18  ;;  %v2320_v53 = vmul.f32 %v859_v41, %v2127_v24  ;;  %s2390_s3 = sld [smem:[#allocation10 + $0x405]] }
  0xae   : > { %v2323_v29 = vadd.f32 %v2179_v46, %v672_v12  ;;  %v734_v34 = vadd.f32 %v2156_v35, %v731_v38  ;;  %v793_v63 = vadd.f32 %v2220_v9, %v790_v15  ;;  %v2328_v8 = vmul.f32 %v875_v50, %v2024_v42  ;;  %s2394_s24 = sld [smem:[#allocation10 + $0x483]] }
  0xaf   : > { %v645_v19 = vmul.f32 %v2315_v33, %v2315_v33  ;;  %v2333_v40 = vadd.f32 %v2182_v47, %v703_v28  ;;  %v765_v56 = vadd.f32 %v2202_v57, %v762_v30  ;;  %v843_v27 = vstv %s2284_s1  ;;  %s2398_s21 = sld [smem:[#allocation10 + $0x484]] }
  0xb0   : > { %v676_v46 = vmul.f32 %v2323_v29, %v2323_v29  ;;  %v2340_v35 = vadd.f32 %v2189_v31, %v734_v34  ;;  %v796_v9 = vadd.f32 %v2227_v16, %v793_v63  ;;  %v821_v20 = vadd.f32 %v2244_v32, %v818_v23  ;;  %s2403_s30 = sld [smem:[#allocation13]] }
  0xb1   : > { %v646_v25 = vmul.f32 %v645_v19, %v2315_v33  ;;  %v707_v26 = vmul.f32 %v2333_v40, %v2333_v40  ;;  %v2348_v47 = vadd.f32 %v2205_v59, %v765_v56  ;;  %v878_v57 = vstv %s2293_s2  ;;  %s2409_s4 = sld [smem:[#allocation13 + $0x1]] }
  0xb2   : > { %v677_v61 = vmul.f32 %v676_v46, %v2323_v29  ;;  %v738_v41 = vmul.f32 %v2340_v35, %v2340_v35  ;;  %v2355_v31 = vadd.f32 %v2235_v21, %v796_v9  ;;  %v881_v16 = vstv %s2298_s14  ;;  %s2414_s5 = sld [smem:[#allocation13 + $0x2]] }
  0xb3   : > { %v647_v32 = vmul.f32 0.044715, %v646_v25  ;;  %v708_v36 = vmul.f32 %v707_v26, %v2333_v40  ;;  %v769_v59 = vmul.f32 %v2348_v47, %v2348_v47  ;;  %v846_v39 = vadd.f32 %v2263_v55, %v843_v27  ;;  %s2418_s12 = sld [smem:[#allocation13 + $0x3]] }
  0xb4   : > { %v678_v52 = vmul.f32 0.044715, %v677_v61  ;;  %v739_v49 = vmul.f32 %v738_v41, %v2340_v35  ;;  %v800_v21 = vmul.f32 %v2355_v31, %v2355_v31  ;;  %v824_v4 = vadd.f32 %v2252_v44, %v821_v20  ;;  %s2426_s27 = sld [smem:[#allocation2]] }
  0xb5   : > { %v648_v54 = vadd.f32 %v647_v32, %v2315_v33  ;;  %v709_v7 = vmul.f32 0.044715, %v708_v36  ;;  %v770_v1 = vmul.f32 %v769_v59, %v2348_v47  ;;  %v906_v10 = vstv %s2312_s13  ;;  %s2431_s28 = sld [smem:[#allocation10 + $0x485]] }
  0xb6   : > { %v679_v55 = vadd.f32 %v678_v52, %v2323_v29  ;;  %v740_v2 = vmul.f32 0.044715, %v739_v49  ;;  %v801_v58 = vmul.f32 %v800_v21, %v2355_v31  ;;  %v827_v17 = vadd.f32 %v2255_v45, %v824_v4  ;;  %s2434_s6 = sld [smem:[#allocation10 + $0x500]] }
  0xb7   : > { %v649_v44 = vmul.f32 0.7978846, %v648_v54  ;;  %v710_v6 = vadd.f32 %v709_v7, %v2333_v40  ;;  %v771_v37 = vmul.f32 0.044715, %v770_v1  ;;  %v849_v5 = vadd.f32 %v2266_v48, %v846_v39  ;;  %s2439_s26 = sld [smem:[#allocation10 + $0x501]] }
  0xb8   : > { %v680_v50 = vmul.f32 0.7978846, %v679_v55  ;;  %v741_v11 = vadd.f32 %v740_v2, %v2340_v35  ;;  %v802_v62 = vmul.f32 0.044715, %v801_v58  ;;  %v2388_v18 = vadd.f32 %v2258_v22, %v827_v17  ;;  %s2443_s9 = sld [smem:[#allocation11 + $0xa]] }
  0xb9   : > { %1418 = vtanh.f32 %v649_v44  ;;  %v711_v45 = vmul.f32 0.7978846, %v710_v6  ;;  %v772_v12 = vadd.f32 %v771_v37, %v2348_v47  ;;  %v852_v38 = vadd.f32 %v2271_v13, %v849_v5  ;;  %s2448_s22 = sld [smem:[#allocation10 + $0x502]] }
  0xba   : > { %1420 = vtanh.f32 %v680_v50  ;;  %v742_v48 = vmul.f32 0.7978846, %v741_v11  ;;  %v803_v15 = vadd.f32 %v802_v62, %v2355_v31  ;;  %v879_v23 = vmul.f32 %v878_v57, %v2029_v43  ;;  %s2452_s8 = sld [smem:[#allocation10 + $0x503]] }
  0xbb   : > { %1422 = vtanh.f32 %v711_v45  ;;  %v773_v22 = vmul.f32 0.7978846, %v772_v12  ;;  %v831_v28 = vmul.f32 %v2388_v18, %v2388_v18  ;;  %v855_v30 = vadd.f32 %v2274_v3, %v852_v38  ;;  %s2457_s25 = sld [smem:[#allocation10 + $0x504]] }
  0xbc   : > { %v874_v13 = vstv %s2364_s20  ;;  %v882_v34 = vmul.f32 %v881_v16, %v2046_v51  ;;  %v884_v63 = vstv %s2358_s15  ;;  %v907_v19 = vmul.f32 %v906_v10, %v2024_v42  ;;  %s2463_s7 = sld [smem:[#allocation13 + $0x4]] }
  0xbd   : > { %1424 = vtanh.f32 %v742_v48  ;;  %v832_v56 = vmul.f32 %v831_v28, %v2388_v18  ;;  %v858_v27 = vadd.f32 %v2307_v0, %v855_v30  ;;  %v877_v46 = vadd.f32 %v2328_v8, %v874_v13  ;;  %s2467_s29 = sld [smem:[#allocation10 + $0x505]] }
  0xbe   : > { %v804_v3 = vmul.f32 0.7978846, %v803_v15  ;;  %v905_v9 = vstv %s2375_s0  ;;  %v909_v20 = vstv %s2370_s10  ;;  %1426 = vtanh.f32 %v773_v22  ;;  %s2472_s23 = sld [smem:[#allocation10 + $0x580]] }
  0xbf   : > { %v1419_v25 = vpop.eup %1418  ;;  %v2421_v26 = vadd.f32 %v2320_v53, %v858_v27  ;;  %v880_v57 = vadd.f32 %v879_v23, %v877_v46  ;;  %v885_v61 = vmul.f32 %v884_v63, %v2061_v60  ;;  %v833_v16 = vmul.f32 0.044715, %v832_v56  ;;  %s2476_s18 = sld [smem:[#allocation10 + $0x581]] }
  0xc0   : > { %v1421_v0 = vpop.eup %1420  ;;  %v651_v41 = vadd.f32 1.0, %v1419_v25  ;;  %v887_v8 = vstv %s2380_s19  ;;  %v912_v32 = vstv %s2384_s11  ;;  %v908_v52 = vadd.f32 %v907_v19, %v905_v9  ;;  %s2481_s17 = sld [smem:[#allocation11 + $0xb]] }
  0xc1   : > { %v1423_v36 = vpop.eup %1422  ;;  %v862_v59 = vmul.f32 %v2421_v26, %v2421_v26  ;;  %v883_v39 = vadd.f32 %v882_v34, %v880_v57  ;;  %v910_v53 = vmul.f32 %v909_v20, %v2029_v43  ;;  %v682_v21 = vadd.f32 1.0, %v1421_v0  ;;  %s2485_s16 = sld [smem:[#allocation10 + $0x582]] }
  0xc2   : > { %v652_v49 = vmul.f32 0.5, %v651_v41  ;;  %1428 = vtanh.f32 %v804_v3  ;;  %v890_v4 = vstv %s2390_s3  ;;  %v888_v7 = vmul.f32 %v887_v8, %v2099_v14  ;;  %s2491_s1 = sld [smem:[#allocation10 + $0x583]] }
  0xc3   : > { %v1425_v54 = vpop.eup %1424  ;;  %v913_v1 = vmul.f32 %v912_v32, %v2046_v51  ;;  %v915_v10 = vstv %s2394_s24  ;;  %v713_v55 = vadd.f32 1.0, %v1423_v36  ;;  %v834_v2 = vadd.f32 %v833_v16, %v2388_v18  ;;  %s2500_s2 = sld [smem:[#allocation10 + $0x584]] }
  0xc4   : > { %v863_v58 = vmul.f32 %v862_v59, %v2421_v26  ;;  %v886_v17 = vadd.f32 %v885_v61, %v883_v39  ;;  %v1427_v44 = vpop.eup %1426  ;;  %v654_v6 = vstv %s2403_s30  ;;  %v685_v37 = vstv %s2409_s4  ;;  %s2506_s14 = sld [smem:[#allocation10 + $0x585]] }
  0xc5   : > { %v891_v5 = vmul.f32 %v890_v4, %v2127_v24  ;;  %v911_v50 = vadd.f32 %v910_v53, %v908_v52  ;;  %v653_v11 = vmul.f32 %v652_v49, %v2315_v33  ;;  %v683_v62 = vmul.f32 0.5, %v682_v21  ;;  %s2513_s13 = sld [smem:[#allocation13 + $0x5]] }
  0xc6   : > { %v744_v45 = vadd.f32 1.0, %v1425_v54  ;;  %v918_v12 = vstv %s2398_s21  ;;  %v716_v38 = vstv %s2414_s5  ;;  %v747_v48 = vstv %s2418_s12  ;;  %s2524_s15 = sld [smem:[#allocation13 + $0x6]] }
  0xc7   : > { %v889_v15 = vadd.f32 %v888_v7, %v886_v17  ;;  %v916_v23 = vmul.f32 %v915_v10, %v2061_v60  ;;  %v714_v28 = vmul.f32 0.5, %v713_v55  ;;  %v775_v30 = vadd.f32 1.0, %v1427_v44  ;;  %s1277_s20 = sld [smem:[#allocation13 + $0x7]] }
  0xc8   : > { %v1429_v22 = vpop.eup %1428  ;;  %v835_v13 = vmul.f32 0.7978846, %v834_v2  ;;  %v864_v34 = vmul.f32 0.044715, %v863_v58  ;;  %v625_v63 = vstv %s2426_s27  ;;  %v914_v19 = vadd.f32 %v913_v1, %v911_v50  ;;  %s1278_s10 = sld [smem:[#allocation13 + $0x8]] }
  0xc9   : > { %v2460_v33 = vadd.f32 %v891_v5, %v889_v15  ;;  %v919_v56 = vmul.f32 %v918_v12, %v2099_v14  ;;  %v655_v27 = vmul.f32 %v654_v6, %v653_v11  ;;  %v684_v46 = vmul.f32 %v683_v62, %v2323_v29  ;;  %s1279_s0 = sld [smem:[#allocation13 + $0x9]] }
  0xca   : > { %v745_v3 = vmul.f32 0.5, %v744_v45  ;;  %v921_v9 = vstv %s2431_s28  ;;  %v806_v20 = vadd.f32 1.0, %v1429_v22  ;;  %v917_v57 = vadd.f32 %v916_v23, %v914_v19  ;;  %s1280_s19 = sld [smem:[#allocation13 + $0xa]] }
  0xcb   : > { %v893_v25 = vmul.f32 %v2460_v33, %v2460_v33  ;;  %v922_v61 = vmul.f32 %v921_v9, %v2127_v24  ;;  %v715_v0 = vmul.f32 %v714_v28, %v2333_v40  ;;  %v776_v41 = vmul.f32 0.5, %v775_v30  ;;  %s2649_s11 = sld [smem:[#allocation30_spill]] }
  0xcc   : > { %1430 = vtanh.f32 %v835_v13  ;;  %v865_v29 = vadd.f32 %v864_v34, %v2421_v26  ;;  %v920_v8 = vadd.f32 %v919_v56, %v917_v57  ;;  %v936_v32 = vstv %s2443_s9  ;;  %s2650_s3 = sld [smem:[#allocation23_spill]] }
  0xcd   : > { %v894_v16 = vmul.f32 %v893_v25, %v2460_v33  ;;  %v937_v36 = vstv %s2434_s6  ;;  %v656_v59 = vadd.f32 %v655_v27, %v625_v63  ;;  %v686_v39 = vmul.f32 %v685_v37, %v684_v46  ;;  %s1281_s24 = sld [smem:[#allocation13 + $0xb]] }
  0xce   : > { %v938_v40 = vmul.f32 %v937_v36, %v2024_v42  ;;  %v940_v52 = vstv %s2439_s26  ;;  %v2487_v49 = vadd.f32 %v922_v61, %v920_v8  ;;  %v943_v4 = vstv %s2448_s22  ;;  %s2651_s21 = sld [smem:[#allocation31_spill]] }
  0xcf   : > { %v895_v53 = vmul.f32 0.044715, %v894_v16  ;;  %v941_v21 = vmul.f32 %v940_v52, %v2029_v43  ;;  %v746_v54 = vmul.f32 %v745_v3, %v2340_v35  ;;  %v866_v7 = vmul.f32 0.7978846, %v865_v29  ;;  %s2652_s27 = sld [smem:[#allocation41_spill]] }
  0xd0   : > { %v939_v1 = vadd.f32 %v938_v40, %v936_v32  ;;  %v944_v10 = vmul.f32 %v943_v4, %v2046_v51  ;;  %v924_v2 = vmul.f32 %v2487_v49, %v2487_v49  ;;  %v946_v58 = vstv %s2452_s8 }
  0xd1   : > { %v896_v55 = vadd.f32 %v895_v53, %v2460_v33  ;;  %v949_v17 = vstv %s2457_s25  ;;  %v778_v6 = vstv %s2463_s7  ;;  %v807_v37 = vmul.f32 0.5, %v806_v20  ;;  %s1166_s30 = sshll.u32 %s2649_s11, 3  ;;  %s1001_s25 = scalar_lea.sflag [#allocation5], %s2649_s11 }
  0xd2   : > { %v1431_v44 = vpop.eup %1430  ;;  %v942_v5 = vadd.f32 %v941_v21, %v939_v1  ;;  %v947_v35 = vmul.f32 %v946_v58, %v2061_v60  ;;  %v687_v50 = vadd.f32 %v686_v39, %v656_v59  ;;  %v717_v11 = vmul.f32 %v716_v38, %v715_v0  ;;  %s1285_s4 = sshll.u32 %s2650_s3, 3  ;;  %s382_s9 = scalar_lea.vmem [#allocation14], %s1166_s30 }
  0xd3   : > { %v777_v62 = vmul.f32 %v776_v41, %v2348_v47  ;;  %v925_v45 = vmul.f32 %v924_v2, %v2487_v49  ;;  %v748_v12 = vmul.f32 %v747_v48, %v746_v54  ;;  %v950_v23 = vmul.f32 %v949_v17, %v2099_v14  ;;  %s1014_s22 = sshll.u32 %s382_s9, 4  ;;  %s1015_s22 = int_to_ptr.vmem [resolvable:$true] %s1014_s22 }
  0xd4   : > { %v945_v15 = vadd.f32 %v944_v10, %v942_v5  ;;  %v952_v22 = vstv %s2467_s29  ;;  %1432 = vtanh.f32 %v866_v7  ;;  %v897_v28 = vmul.f32 0.7978846, %v896_v55 }
  0xd5   : > { %v926_v30 = vmul.f32 0.044715, %v925_v45  ;;  %v953_v38 = vmul.f32 %v952_v22, %v2127_v24  ;;  %v967_v13 = vstv %s2481_s17  ;;  %v968_v34 = vstv %s2472_s23  ;;  %s2653_s6 = smov %s2652_s27  ;;  %s1012_s28 = scalar_lea.hbm %s2652_s27, %s1285_s4 }
  0xd6   : > { %v948_v47 = vadd.f32 %v947_v35, %v945_v15  ;;  %v971_v63 = vstv %s2476_s18  ;;  %v718_v19 = vadd.f32 %v717_v11, %v687_v50  ;;  %v969_v56 = vmul.f32 %v968_v34, %v2024_v42  ;;  %s1016_s8 = sshll.u32 %s1012_s28, 4  ;;  %s1568_s17 = scalar_lea.hbm %s2653_s6, 16  ;;  %s1017_s8 = int_to_ptr.hbm [resolvable:$true] %s1016_s8 }
  0xd7   : > { %v927_v48 = vadd.f32 %v926_v30, %v2487_v49  ;;  %v972_v27 = vmul.f32 %v971_v63, %v2029_v43  ;;  %v837_v46 = vadd.f32 1.0, %v1431_v44  ;;  %v974_v9 = vstv %s2485_s16  ;;  %s1562_s7 = sshra.s32 %s1017_s8, 4  ;;  %s1563_s7 = int_to_ptr.hbm [resolvable:$true] %s1562_s7 }
  0xd8   : > { %v951_v3 = vadd.f32 %v950_v23, %v948_v47  ;;  %v977_v20 = vstv %s2491_s1  ;;  %1434 = vtanh.f32 %v897_v28  ;;  %v970_v57 = vadd.f32 %v969_v56, %v967_v13  ;;  %s1564_s29 = scalar_lea.hbm %s1563_s7, 8  ;;  %p1569_p10 = scmp.lt.s32.totalorder %s1563_s7, %s2653_s6 }
  0xd9   : > { %v928_v25 = vmul.f32 0.7978846, %v927_v48  ;;  %v975_v61 = vmul.f32 %v974_v9, %v2046_v51  ;;  %v980_v41 = vstv %s2500_s2  ;;  %v808_v42 = vmul.f32 %v807_v37, %v2355_v31  ;;  %p1565_p1 = scmp.ne.s32.totalorder %s1563_s7, %s1564_s29  ;;  %p1570_p11 = scmp.lt.s32.totalorder %s1568_s17, %s1564_s29 }
  0xda   : > { %v2526_v0 = vadd.f32 %v953_v38, %v951_v3  ;;  %v1433_v29 = vpop.eup %1432  ;;  %v973_v43 = vadd.f32 %v972_v27, %v970_v57  ;;  %v978_v16 = vmul.f32 %v977_v20, %v2061_v60  ;;  %v749_v8 = vadd.f32 %v748_v12, %v718_v19 }
  0xdb   : > { %v779_v32 = vmul.f32 %v778_v6, %v777_v62  ;;  %v983_v59 = vstv %s2506_s14  ;;  %v838_v39 = vmul.f32 0.5, %v837_v46  ;;  %1436 = vtanh.f32 %v928_v25  ;;  %p1566_p3 = pnand %p1565_p1, %p1798_p5  ;;  %p1571_p12 = por %p1570_p11, %p1569_p10 }
  0xdc   : > { %v955_v36 = vmul.f32 %v2526_v0, %v2526_v0  ;;  %v976_v51 = vadd.f32 %v975_v61, %v973_v43  ;;  %v981_v40 = vmul.f32 %v980_v41, %v2099_v14  ;;  %v809_v52 = vstv %s2513_s13  ;;  %v1442_v43 = vld [vmem:[%s2651_s21 + $0x8] sm:$0xff] }
  0xdd   : > { %v868_v53 = vadd.f32 1.0, %v1433_v29  ;;  %v984_v60 = vmul.f32 %v983_v59, %v2127_v24  ;;  %v780_v7 = vadd.f32 %v779_v32, %v749_v8  ;;  %v810_v1 = vmul.f32 %v809_v52, %v808_v42  ;;  %p1567_p8 = pneg %p1566_p3 }
  0xde   : > { %v956_v21 = vmul.f32 %v955_v36, %v2526_v0  ;;  %v1435_v31 = vpop.eup %1434  ;;  %v979_v4 = vadd.f32 %v978_v16, %v976_v51  ;;  %v839_v10 = vmul.f32 %v838_v39, %v2388_v18  ;;  %v840_v2 = vstv %s2524_s15 }
  0xdf   : > { %v869_v58 = vmul.f32 0.5, %v868_v53  ;;  %v899_v17 = vadd.f32 1.0, %v1435_v31  ;;  %v811_v5 = vadd.f32 %v810_v1, %v780_v7  ;;  %v871_v18 = vstv %s1277_s20  ;;  %p1572_p13 = pnand %p1571_p12, %p1567_p8 }
  0xe0   : > { %v957_v54 = vmul.f32 0.044715, %v956_v21  ;;  %v982_v55 = vadd.f32 %v981_v40, %v979_v4  ;;  %v841_v35 = vmul.f32 %v840_v2, %v839_v10  ;;  %v902_v30 = vstv %s1278_s10 }
  0xe1   : > { %v1437_v44 = vpop.eup %1436  ;;  %v870_v24 = vmul.f32 %v869_v58, %v2421_v26  ;;  %v900_v11 = vmul.f32 0.5, %v899_v17  ;;  %v933_v48 = vstv %s1279_s0  ;;  %v964_v3 = vstv %s1280_s19 }
  0xe2   : > { %v958_v14 = vadd.f32 %v957_v54, %v2526_v0  ;;  %v985_v6 = vadd.f32 %v984_v60, %v982_v55  ;;  %v930_v62 = vadd.f32 1.0, %v1437_v44  ;;  %v842_v15 = vadd.f32 %v841_v35, %v811_v5 }
  0xe3   : > { %v872_v23 = vmul.f32 %v871_v18, %v870_v24  ;;  %v901_v22 = vmul.f32 %v900_v11, %v2460_v33  ;;  %v995_v41 = vstv %s1281_s24 }
  0xe4   : > { %v959_v37 = vmul.f32 0.7978846, %v958_v14  ;;  %v986_v50 = vmul.f32 %v985_v6, %v985_v6  ;;  %v931_v28 = vmul.f32 0.5, %v930_v62 }
  0xe5   : > { %v873_v26 = vadd.f32 %v872_v23, %v842_v15  ;;  %v903_v63 = vmul.f32 %v902_v30, %v901_v22 }
  0xe6   : > { %1438 = vtanh.f32 %v959_v37  ;;  %v987_v45 = vmul.f32 %v986_v50, %v985_v6  ;;  %v932_v19 = vmul.f32 %v931_v28, %v2487_v49 }
  0xe7   : > { %v904_v27 = vadd.f32 %v903_v63, %v873_v26 }
  0xe8   : > { %v988_v12 = vmul.f32 0.044715, %v987_v45  ;;  %v934_v46 = vmul.f32 %v933_v48, %v932_v19 }
  0xea   : > { %v989_v38 = vadd.f32 %v988_v12, %v985_v6  ;;  %v935_v20 = vadd.f32 %v934_v46, %v904_v27 }
  0xec   : > { %v1439_v47 = vpop.eup %1438  ;;  %v990_v34 = vmul.f32 0.7978846, %v989_v38 }
  0xed   : > { %v961_v13 = vadd.f32 1.0, %v1439_v47 }
  0xee   : > { %1440 = vtanh.f32 %v990_v34 }
  0xef   : > { %v962_v56 = vmul.f32 0.5, %v961_v13 }
  0xf1   : > { %v963_v33 = vmul.f32 %v962_v56, %v2526_v0 }
  0xf3   : > { %v965_v25 = vmul.f32 %v964_v3, %v963_v33 }
  0xf4   : > { %v1441_v9 = vpop.eup %1440 }
  0xf5   : > { %v992_v57 = vadd.f32 1.0, %v1441_v9  ;;  %v966_v49 = vadd.f32 %v965_v25, %v935_v20 }
  0xf7   : > { %v993_v61 = vmul.f32 0.5, %v992_v57 }
  0xf9   : > { %v994_v29 = vmul.f32 %v993_v61, %v985_v6 }
  0xfb   : > { %v996_v42 = vmul.f32 %v995_v41, %v994_v29 }
  0xfd   : > { %v997_v0 = vadd.f32 %v996_v42, %v966_v49 }
  0xff   : > { %v998_v16 = vmul.f32 %v1442_v43, %v997_v0 }
 0x101   : > { %999 = vst [vmem:[%s382_s9] sm:$0xff] %v998_v16 }
 0x102   : > { %1575 = shalt.err (!%p1572_p13)
}
 0x103   : > { %1313 = dma.vmem_to_hbm [thread:$0]  (%p1798_p5), %s1015_s22, 128, %s1017_s8, %s1001_s25  }
 0x104 PF: > { %s2655_s2 = sld [smem:[#allocation20_spill]]  ;;  %p1336_p0 = pnand %p1158_p4, %p1806_p7 }
 0x105   : > { %s2657_s13 = sld [smem:[#allocation25_spill]] }
 0x106   : > { %p1337_p2 = pneg %p1336_p0 }
 0x10a   : > { %s1028_s15 = sand.u32 1, %s2655_s2  }
 0x10b   : > { %s1029_s20 = scalar_lea.sflag [#allocation5], %s1028_s15 }
 0x10c   : > { %1617 = dma.done.wait (%p1337_p2), %s1029_s20, 128  }
 0x10d   : > { %1619 = vsyncadd (%p1337_p2), %s1029_s20, 4294967168  ;;  %s27_s8 = sadd.s32 1, %s2657_s13   ;;  %s2658_s26 = sld [smem:[#allocation21_spill]] }
 0x10e   : > { %p24_p6 = scmp.ge.s32.totalorder %s27_s8, 4   ;;  %s2659_s27 = sld [smem:[#allocation22_spill]] }
 0x10f   : > { %s2660_s28 = sld [smem:[#allocation28_spill]] }
 0x110   : > { %s2661_s29 = sld [smem:[#allocation24_spill]]  ;;  %26 = sbr.rel (!%p24_p6) target bundleno = 18 (0x12), region = 116 }
 0x111   : > { %s2662_s30 = sld [smem:[#allocation26_spill]] }
 0x115   :  { %1035 = vsyncpa [#allocation4], 1 }
 0x116   :  { %1037 = vsyncpa [#allocation4 + $0x1], 1 }
 0x117   :  { %1038 = vsyncpa [#allocation5], 1 }
 0x118   :  { %1040 = vsyncpa [#allocation5 + $0x1], 1 }
 0x119   :  { %1041 = vsyncpa [#allocation6], 1 }
 0x11a   :  { %1043 = vsyncpa [#allocation6 + $0x1], 1 }
 0x11b   :  { %1044 = vsyncpa [#allocation9], 1 }
 0x11c   :  { %1045 = vsyncpa [#allocation12], 1 }

</bundles_post_ra>
